<compile_context>
chip_gen: v6e
topology: v6e:2x2x1
jax: 0.10.0
libtpu: 0.0.40
codegen_flags: <defaults>
</compile_context>

<pallas_src>
import functools

import jax
import jax.numpy as jnp
from jax.experimental import pallas as pl
from jax.experimental.pallas import tpu as pltpu

_BN_EPS = 1e-5


# --------------------------------- kernel ---------------------------------- #

def _bottleneck_kernel(x_ref, w1_ref, b1_ref, w2_ref, b2_ref, w3_ref, b3_ref,
                       m_ref, o_ref, y1pad_ref, xs_ref, *, W, pad,
                       compute_dtype):
    """Fused bottleneck for one lane-tile of (batch_tile) images.

    x_ref:     (Cin, L)            input, channel-major, L = batch_tile*H*W lanes, f32
    w1_ref:    (width, Cin)        conv1 weight (bn1 scale folded), compute dtype
    b1_ref:    (width, 1)          bn1 shift, f32
    w2_ref:    (width, 9*width)    stacked block-diagonal grouped-3x3 weights
    b2_ref:    (width, 1)          bn2 shift, f32
    w3_ref:    (Cexp, width)       conv3 weight (bn3 scale folded), compute dtype
    b3_ref:    (Cexp, 1)           bn3 shift, f32
    m_ref:     (9, 1, L)           per-tap validity mask (0/1), compute dtype
    o_ref:     (Cexp, L)           output, f32
    y1pad_ref: (width, L + 2*pad)  VMEM scratch: y1 with a zero halo
    xs_ref:    (9*width, L)        VMEM scratch: staged shifted/masked slices
    """
    L = x_ref.shape[1]
    width = w1_ref.shape[0]
    cd = compute_dtype

    # Zero only the two halo regions (the interior is fully overwritten each
    # step).  Done every step -- it is 2 x (width, pad) stores, negligible --
    # so correctness does not depend on scratch persistence if a megacore
    # shards the "parallel" grid axis across TensorCores.
    y1pad_ref[:, :pad] = jnp.zeros((width, pad), y1pad_ref.dtype)
    y1pad_ref[:, pad + L:] = jnp.zeros((width, pad), y1pad_ref.dtype)

    x = x_ref[...]                                                # (Cin, L) f32

    # ---- conv1 (1x1) + bn1 + relu -------------------------------------------
    y1 = jnp.dot(w1_ref[...], x.astype(cd),
                 preferred_element_type=jnp.float32)
    y1 = jnp.maximum(y1 + b1_ref[...], 0.0)                       # (width, L) f32
    y1pad_ref[:, pad:pad + L] = y1.astype(cd)

    # ---- conv2 (3x3, grouped) as ONE stacked-K contraction -------------------
    # Stage the 9 statically shifted, mask-zeroed slices (masks applied to the
    # compute-dtype input so the multiplies never touch the f32 accumulator and
    # overlap the conv1 matmul), then a single MXU matmul with K = 9*width.
    for kh in range(3):
        for kw in range(3):
            k = 3 * kh + kw
            off = (kh - 1) * W + (kw - 1)
            xs = y1pad_ref[:, pad + off: pad + off + L]           # shifted y1
            if kh == 1 and kw == 1:                               # center tap: all-ones mask
                xs_ref[k * width:(k + 1) * width, :] = xs
            else:
                xs_ref[k * width:(k + 1) * width, :] = xs * m_ref[k]
    y2 = jnp.dot(w2_ref[...], xs_ref[...],
                 preferred_element_type=jnp.float32)
    y2 = jnp.maximum(y2 + b2_ref[...], 0.0)                       # (width, L) f32

    # ---- conv3 (1x1) + bn3 + identity + relu ----------------------------------
    out = jnp.dot(w3_ref[...], y2.astype(cd),
                  preferred_element_type=jnp.float32)
    o_ref[...] = jnp.maximum(out + b3_ref[...] + x, 0.0).astype(o_ref.dtype)


# ----------------------------- parameter prep ------------------------------ #

def _fold_bn(bn):
    gamma, beta, mean, var = bn
    scale = gamma / jnp.sqrt(var + _BN_EPS)
    shift = beta - mean * scale
    return scale.astype(jnp.float32), shift.astype(jnp.float32)


def prepare_bottleneck(params, *, groups, H, W, compute_dtype=jnp.bfloat16):
    """One-time prep: BN folding, weight reshapes, stacked-K block-diagonal
    grouped weights and per-tap validity masks.  compute_dtype=bfloat16 is the
    default (full-rate MXU operands); pass float32 for bit-tight checks."""
    w1 = params["conv1_w"][:, :, 0, 0]                 # (width, Cin)
    w2 = params["conv2_w"]                             # (width, width//g, 3, 3)
    w3 = params["conv3_w"][:, :, 0, 0]                 # (Cexp, width)
    width, cin = w1.shape
    cexp = w3.shape[0]
    cin_g = w2.shape[1]
    cout_g = width // groups

    s1, t1 = _fold_bn(params["bn1"])
    s2, t2 = _fold_bn(params["bn2"])
    s3, t3 = _fold_bn(params["bn3"])

    w1f = (w1 * s1[:, None]).astype(compute_dtype)
    w3f = (w3 * s3[:, None]).astype(compute_dtype)

    # Block-diagonal (9, width, width) grouped-3x3 weights (bn2 scale folded),
    # then stacked along K -> (width, 9*width) for the single conv2 matmul.
    # TODO(synk): at real ResNeXt widths (width=512, groups=32) do NOT
    # materialize the block-diagonal form (mostly zeros; wastes MXU MACs and
    # VMEM, critical on v7x's 64 MiB); keep (9, width, width//groups) and
    # loop over groups / re-derive lane tiling + vmem_limit_bytes.
    w2_bd = jnp.zeros((9, width, width), jnp.float32)
    for gi in range(groups):
        blk = w2[gi * cout_g:(gi + 1) * cout_g]                   # (cout_g, cin_g, 3, 3)
        blk = jnp.transpose(blk, (2, 3, 0, 1)).reshape(9, cout_g, cin_g)
        w2_bd = w2_bd.at[:, gi * cout_g:(gi + 1) * cout_g,
                         gi * cin_g:(gi + 1) * cin_g].set(blk)
    w2_bd = w2_bd * s2[None, :, None]
    w2_stacked = jnp.transpose(w2_bd, (1, 0, 2)).reshape(width, 9 * width)
    w2_stacked = w2_stacked.astype(compute_dtype)

    # Per-tap validity masks for a pad=1, stride=1 3x3 conv on an HxW image.
    # The row component is NOT redundant here: with the batch collapsed onto
    # the lane axis it is exactly what prevents taps from reading the
    # neighbouring image across batch seams.
    HW = H * W
    p = jnp.arange(HW)
    hh = p // W
    ww = p % W
    masks = []
    for kh in range(3):
        for kw in range(3):
            dh, dw = kh - 1, kw - 1
            m = ((hh + dh >= 0) & (hh + dh < H) &
                 (ww + dw >= 0) & (ww + dw < W))
            masks.append(m)
    masks = jnp.stack(masks).reshape(9, 1, HW).astype(compute_dtype)

    return dict(
        w1=w1f, b1=t1[:, None],
        w2=w2_stacked, b2=t2[:, None],
        w3=w3f, b3=t3[:, None],
        masks=masks,
        width=width, cexp=cexp, cin=cin, H=H, W=W,
        compute_dtype=compute_dtype,
    )


# ------------------------------- forward call ------------------------------ #

def bottleneck_apply(x_nchw, prep, *, batch_tile=None):
    N, Cin, H, W = x_nchw.shape
    HW = H * W
    width, cexp = prep["width"], prep["cexp"]
    cd = prep["compute_dtype"]
    assert Cin == prep["cin"] and (H, W) == (prep["H"], prep["W"])
    # identity add (downsample=None) requires in_channel == expansion*out_channel
    assert Cin == cexp, "residual add requires in_channel == 4*out_channel"
    # TODO(synk): stride>1 / downsample branch not implemented (module defaults).

    # One grid step over the whole batch by default (best on single-TC
    # v5e/v6e in this overhead-bound regime).  On v7x pass batch_tile=N//2 so
    # both TensorCores get a "parallel" grid step.
    if batch_tile is None:
        batch_tile = N
    assert N % batch_tile == 0
    num_tiles = N // batch_tile
    L = batch_tile * HW                                   # lanes per grid step

    # Lane-aligned halo (>= W+1) so the interior scratch store stays 128-aligned.
    pad = -(-(W + 1) // 128) * 128

    # Channel-major layout with the batch collapsed onto the lane axis
    # (Cin, N*HW).  Pure layout plumbing in the wrapper.
    x2d = jnp.transpose(x_nchw.reshape(N, Cin, HW), (1, 0, 2)) \
             .reshape(Cin, N * HW).astype(jnp.float32)
    masks = jnp.tile(prep["masks"], (1, 1, batch_tile))   # (9, 1, L), same per tile

    kernel = functools.partial(_bottleneck_kernel, W=W, pad=pad,
                               compute_dtype=cd)
    out = pl.pallas_call(
        kernel,
        out_shape=jax.ShapeDtypeStruct((cexp, N * HW), jnp.float32),
        grid=(num_tiles,),
        in_specs=[
            pl.BlockSpec((Cin, L), lambda t: (0, t)),               # x
            pl.BlockSpec((width, Cin), lambda t: (0, 0)),           # w1
            pl.BlockSpec((width, 1), lambda t: (0, 0)),             # b1
            pl.BlockSpec((width, 9 * width), lambda t: (0, 0)),     # w2 (stacked-K)
            pl.BlockSpec((width, 1), lambda t: (0, 0)),             # b2
            pl.BlockSpec((cexp, width), lambda t: (0, 0)),          # w3
            pl.BlockSpec((cexp, 1), lambda t: (0, 0)),              # b3
            pl.BlockSpec((9, 1, L), lambda t: (0, 0, 0)),           # masks
        ],
        out_specs=pl.BlockSpec((cexp, L), lambda t: (0, t)),
        scratch_shapes=[pltpu.VMEM((width, L + 2 * pad), cd),       # y1 + halo
                        pltpu.VMEM((9 * width, L), cd)],            # staged taps
        compiler_params=pltpu.CompilerParams(
            dimension_semantics=("parallel",)),
    )(x2d, prep["w1"], prep["b1"], prep["w2"], prep["b2"],
      prep["w3"], prep["b3"], masks)

    return jnp.transpose(out.reshape(cexp, N, H, W), (1, 0, 2, 3))


# ----------------------------- reference (plain JAX) ------------------------ #

def ref_forward(x, params, *, groups):
    def bn(y, p):
        gamma, beta, mean, var = p
        return (gamma[None, :, None, None] * (y - mean[None, :, None, None])
                / jnp.sqrt(var[None, :, None, None] + _BN_EPS)
                + beta[None, :, None, None])

    dn = ("NCHW", "OIHW", "NCHW")
    y = jax.lax.conv_general_dilated(x, params["conv1_w"], (1, 1), "VALID",
                                     dimension_numbers=dn)
    y = jax.nn.relu(bn(y, params["bn1"]))
    y = jax.lax.conv_general_dilated(y, params["conv2_w"], (1, 1),
                                     ((1, 1), (1, 1)), dimension_numbers=dn,
                                     feature_group_count=groups)
    y = jax.nn.relu(bn(y, params["bn2"]))
    y = jax.lax.conv_general_dilated(y, params["conv3_w"], (1, 1), "VALID",
                                     dimension_numbers=dn)
    y = bn(y, params["bn3"]) + x
    return jax.nn.relu(y)


# ----------------------------------- main ----------------------------------- #

def _init_bn(key, c):
    k1, k2, k3, k4 = jax.random.split(key, 4)
    gamma = jax.random.uniform(k1, (c,), jnp.float32, 0.5, 1.5)
    beta = jax.random.normal(k2, (c,), jnp.float32) * 0.1
    mean = jax.random.normal(k3, (c,), jnp.float32) * 0.1
    var = jax.random.uniform(k4, (c,), jnp.float32, 0.5, 1.5)
    return (gamma, beta, mean, var)


if __name__ == "__main__":
    # Bottleneck(in_channel=32, out_channel=8, groups=2, width_per_group=64)
    #   width = int(8 * 64/64) * 2 = 16 ; expansion*out_channel = 32 == in_channel
    in_channel, out_channel, groups, width_per_group = 32, 8, 2, 64
    width = int(out_channel * (width_per_group / 64.0)) * groups
    c_exp = out_channel * 4
    N, H, W = 2, 16, 16

    key = jax.random.PRNGKey(0)
    kx, k1, k2, k3, kb1, kb2, kb3 = jax.random.split(key, 7)
    x = jax.random.normal(kx, (N, in_channel, H, W), jnp.float32)

    params = {
        "conv1_w": jax.random.normal(k1, (width, in_channel, 1, 1), jnp.float32) * 0.1,
        "conv2_w": jax.random.normal(k2, (width, width // groups, 3, 3), jnp.float32) * 0.1,
        "conv3_w": jax.random.normal(k3, (c_exp, width, 1, 1), jnp.float32) * 0.1,
        "bn1": _init_bn(kb1, width),
        "bn2": _init_bn(kb2, width),
        "bn3": _init_bn(kb3, c_exp),
    }

    ref = jax.block_until_ready(ref_forward(x, params, groups=groups))

    # (a) f32 operands: tight check of the fused-kernel structure.
    prep32 = prepare_bottleneck(params, groups=groups, H=H, W=W,
                                compute_dtype=jnp.float32)
    out32 = jax.block_until_ready(bottleneck_apply(x, prep32))
    assert out32.shape == (N, c_exp, H, W)
    assert jnp.allclose(out32, ref, rtol=1e-4, atol=1e-4), \
        f"f32 max abs diff {float(jnp.max(jnp.abs(out32 - ref)))}"

    # (b) bf16 MXU-operand default, single grid step over the whole batch.
    prep16 = prepare_bottleneck(params, groups=groups, H=H, W=W)
    out16 = jax.block_until_ready(bottleneck_apply(x, prep16))
    assert jnp.allclose(out16, ref, rtol=5e-2, atol=1e-1), \
        f"bf16 max abs diff {float(jnp.max(jnp.abs(out16 - ref)))}"

    # (c) bf16 with two "parallel" grid steps (the v7x two-TensorCore config).
    out16b = jax.block_until_ready(bottleneck_apply(x, prep16, batch_tile=1))
    assert jnp.allclose(out16b, ref, rtol=5e-2, atol=1e-1), \
        f"bf16/2-step max abs diff {float(jnp.max(jnp.abs(out16b - ref)))}"

    print("KERNEL_OK")
</pallas_src>

<mosaic_0001>
module attributes {stable_mosaic.version = 11 : i64} {
  func.func @_bottleneck_kernel(%arg0: i32, %arg1: memref<32x512xf32, #tpu.memory_space<vmem>>, %arg2: memref<16x32xf32, #tpu.memory_space<vmem>>, %arg3: memref<16x1xf32, #tpu.memory_space<vmem>>, %arg4: memref<16x144xf32, #tpu.memory_space<vmem>>, %arg5: memref<16x1xf32, #tpu.memory_space<vmem>>, %arg6: memref<32x16xf32, #tpu.memory_space<vmem>>, %arg7: memref<32x1xf32, #tpu.memory_space<vmem>>, %arg8: memref<9x1x512xf32, #tpu.memory_space<vmem>>, %arg9: memref<32x512xf32, #tpu.memory_space<vmem>>, %arg10: memref<16x768xf32, #tpu.memory_space<vmem>>, %arg11: memref<144x512xf32, #tpu.memory_space<vmem>>) attributes {dimension_semantics = [#tpu.dimension_semantics<parallel>], iteration_bounds = array<i64: 1>, scalar_prefetch = 0 : i64, scratch_operands = 2 : i64, tpu.core_type = #tpu.core_type<tc>, window_params = [{transform_indices = @transform_0, window_bounds = array<i64: 32, 512>}, {pipeline_mode = #tpu.pipeline_mode<synchronous>, transform_indices = @transform_1, window_bounds = array<i64: 16, 32>}, {pipeline_mode = #tpu.pipeline_mode<synchronous>, transform_indices = @transform_2, window_bounds = array<i64: 16, 1>}, {pipeline_mode = #tpu.pipeline_mode<synchronous>, transform_indices = @transform_3, window_bounds = array<i64: 16, 144>}, {pipeline_mode = #tpu.pipeline_mode<synchronous>, transform_indices = @transform_4, window_bounds = array<i64: 16, 1>}, {pipeline_mode = #tpu.pipeline_mode<synchronous>, transform_indices = @transform_5, window_bounds = array<i64: 32, 16>}, {pipeline_mode = #tpu.pipeline_mode<synchronous>, transform_indices = @transform_6, window_bounds = array<i64: 32, 1>}, {pipeline_mode = #tpu.pipeline_mode<synchronous>, transform_indices = @transform_7, window_bounds = array<i64: 9, 1, 512>}, {transform_indices = @transform_8, window_bounds = array<i64: 32, 512>}]} {
    %cst = arith.constant 0.000000e+00 : f32
    %0 = vector.broadcast %cst : f32 to vector<16x128xf32>
    %c0 = arith.constant 0 : index
    %c0_0 = arith.constant 0 : index
    %1 = vector.load %arg10[%c0, %c0_0] : memref<16x768xf32, #tpu.memory_space<vmem>>, vector<16x128xf32>
    tpu.vector_store %arg10[%c0, %c0_0], %0 {strides = array<i32>} : memref<16x768xf32, #tpu.memory_space<vmem>>, vector<16x128xf32>,
    %cst_1 = arith.constant 0.000000e+00 : f32
    %2 = vector.broadcast %cst_1 : f32 to vector<16x128xf32>
    %c0_2 = arith.constant 0 : index
    %c640 = arith.constant 640 : index
    %3 = vector.load %arg10[%c0_2, %c640] : memref<16x768xf32, #tpu.memory_space<vmem>>, vector<16x128xf32>
    tpu.vector_store %arg10[%c0_2, %c640], %2 {strides = array<i32>} : memref<16x768xf32, #tpu.memory_space<vmem>>, vector<16x128xf32>,
    %c0_3 = arith.constant 0 : index
    %c0_4 = arith.constant 0 : index
    %4 = vector.load %arg1[%c0_3, %c0_4] : memref<32x512xf32, #tpu.memory_space<vmem>>, vector<32x512xf32>
    %c0_5 = arith.constant 0 : index
    %c0_6 = arith.constant 0 : index
    %5 = vector.load %arg2[%c0_5, %c0_6] : memref<16x32xf32, #tpu.memory_space<vmem>>, vector<16x32xf32>
    %cst_7 = arith.constant dense<0.000000e+00> : vector<16x512xf32>
    %6 = tpu.matmul %5, %4, %cst_7 {dimension_numbers = #tpu.dot_dimension_numbers<[1], [0], [0], [1], [0, 0, 1, 1], [], []>} : vector<16x32xf32>, vector<32x512xf32>, vector<16x512xf32> -> vector<16x512xf32>
    %c0_8 = arith.constant 0 : index
    %c0_9 = arith.constant 0 : index
    %7 = vector.load %arg3[%c0_8, %c0_9] : memref<16x1xf32, #tpu.memory_space<vmem>>, vector<16x1xf32>
    %8 = vector.broadcast %7 : vector<16x1xf32> to vector<16x512xf32>
    %9 = arith.addf %6, %8 : vector<16x512xf32>
    %cst_10 = arith.constant 0.000000e+00 : f32
    %10 = vector.broadcast %cst_10 : f32 to vector<16x512xf32>
    %11 = arith.maximumf %9, %10 : vector<16x512xf32>
    %c0_11 = arith.constant 0 : index
    %c128 = arith.constant 128 : index
    %12 = vector.load %arg10[%c0_11, %c128] : memref<16x768xf32, #tpu.memory_space<vmem>>, vector<16x512xf32>
    tpu.vector_store %arg10[%c0_11, %c128], %11 {strides = array<i32>} : memref<16x768xf32, #tpu.memory_space<vmem>>, vector<16x512xf32>,
    %c0_12 = arith.constant 0 : index
    %c111 = arith.constant 111 : index
    %13 = vector.load %arg10[%c0_12, %c111] : memref<16x768xf32, #tpu.memory_space<vmem>>, vector<16x512xf32>
    %c0_13 = arith.constant 0 : index
    %c0_14 = arith.constant 0 : index
    %c0_15 = arith.constant 0 : index
    %14 = vector.load %arg8[%c0_13, %c0_14, %c0_15] : memref<9x1x512xf32, #tpu.memory_space<vmem>>, vector<1x1x512xf32>
    %15 = vector.shape_cast %14 : vector<1x1x512xf32> to vector<1x512xf32>
    %16 = vector.broadcast %15 : vector<1x512xf32> to vector<16x512xf32>
    %17 = arith.mulf %13, %16 : vector<16x512xf32>
    %c0_16 = arith.constant 0 : index
    %c0_17 = arith.constant 0 : index
    %18 = vector.load %arg11[%c0_16, %c0_17] : memref<144x512xf32, #tpu.memory_space<vmem>>, vector<16x512xf32>
    tpu.vector_store %arg11[%c0_16, %c0_17], %17 {strides = array<i32>} : memref<144x512xf32, #tpu.memory_space<vmem>>, vector<16x512xf32>,
    %c0_18 = arith.constant 0 : index
    %c112 = arith.constant 112 : index
    %19 = vector.load %arg10[%c0_18, %c112] : memref<16x768xf32, #tpu.memory_space<vmem>>, vector<16x512xf32>
    %c1 = arith.constant 1 : index
    %c0_19 = arith.constant 0 : index
    %c0_20 = arith.constant 0 : index
    %20 = vector.load %arg8[%c1, %c0_19, %c0_20] : memref<9x1x512xf32, #tpu.memory_space<vmem>>, vector<1x1x512xf32>
    %21 = vector.shape_cast %20 : vector<1x1x512xf32> to vector<1x512xf32>
    %22 = vector.broadcast %21 : vector<1x512xf32> to vector<16x512xf32>
    %23 = arith.mulf %19, %22 : vector<16x512xf32>
    %c16 = arith.constant 16 : index
    %c0_21 = arith.constant 0 : index
    %24 = vector.load %arg11[%c16, %c0_21] : memref<144x512xf32, #tpu.memory_space<vmem>>, vector<16x512xf32>
    tpu.vector_store %arg11[%c16, %c0_21], %23 {strides = array<i32>} : memref<144x512xf32, #tpu.memory_space<vmem>>, vector<16x512xf32>,
    %c0_22 = arith.constant 0 : index
    %c113 = arith.constant 113 : index
    %25 = vector.load %arg10[%c0_22, %c113] : memref<16x768xf32, #tpu.memory_space<vmem>>, vector<16x512xf32>
    %c2 = arith.constant 2 : index
    %c0_23 = arith.constant 0 : index
    %c0_24 = arith.constant 0 : index
    %26 = vector.load %arg8[%c2, %c0_23, %c0_24] : memref<9x1x512xf32, #tpu.memory_space<vmem>>, vector<1x1x512xf32>
    %27 = vector.shape_cast %26 : vector<1x1x512xf32> to vector<1x512xf32>
    %28 = vector.broadcast %27 : vector<1x512xf32> to vector<16x512xf32>
    %29 = arith.mulf %25, %28 : vector<16x512xf32>
    %c32 = arith.constant 32 : index
    %c0_25 = arith.constant 0 : index
    %30 = vector.load %arg11[%c32, %c0_25] : memref<144x512xf32, #tpu.memory_space<vmem>>, vector<16x512xf32>
    tpu.vector_store %arg11[%c32, %c0_25], %29 {strides = array<i32>} : memref<144x512xf32, #tpu.memory_space<vmem>>, vector<16x512xf32>,
    %c0_26 = arith.constant 0 : index
    %c127 = arith.constant 127 : index
    %31 = vector.load %arg10[%c0_26, %c127] : memref<16x768xf32, #tpu.memory_space<vmem>>, vector<16x512xf32>
    %c3 = arith.constant 3 : index
    %c0_27 = arith.constant 0 : index
    %c0_28 = arith.constant 0 : index
    %32 = vector.load %arg8[%c3, %c0_27, %c0_28] : memref<9x1x512xf32, #tpu.memory_space<vmem>>, vector<1x1x512xf32>
    %33 = vector.shape_cast %32 : vector<1x1x512xf32> to vector<1x512xf32>
    %34 = vector.broadcast %33 : vector<1x512xf32> to vector<16x512xf32>
    %35 = arith.mulf %31, %34 : vector<16x512xf32>
    %c48 = arith.constant 48 : index
    %c0_29 = arith.constant 0 : index
    %36 = vector.load %arg11[%c48, %c0_29] : memref<144x512xf32, #tpu.memory_space<vmem>>, vector<16x512xf32>
    tpu.vector_store %arg11[%c48, %c0_29], %35 {strides = array<i32>} : memref<144x512xf32, #tpu.memory_space<vmem>>, vector<16x512xf32>,
    %c0_30 = arith.constant 0 : index
    %c128_31 = arith.constant 128 : index
    %37 = vector.load %arg10[%c0_30, %c128_31] : memref<16x768xf32, #tpu.memory_space<vmem>>, vector<16x512xf32>
    %c64 = arith.constant 64 : index
    %c0_32 = arith.constant 0 : index
    %38 = vector.load %arg11[%c64, %c0_32] : memref<144x512xf32, #tpu.memory_space<vmem>>, vector<16x512xf32>
    tpu.vector_store %arg11[%c64, %c0_32], %37 {strides = array<i32>} : memref<144x512xf32, #tpu.memory_space<vmem>>, vector<16x512xf32>,
    %c0_33 = arith.constant 0 : index
    %c129 = arith.constant 129 : index
    %39 = vector.load %arg10[%c0_33, %c129] : memref<16x768xf32, #tpu.memory_space<vmem>>, vector<16x512xf32>
    %c5 = arith.constant 5 : index
    %c0_34 = arith.constant 0 : index
    %c0_35 = arith.constant 0 : index
    %40 = vector.load %arg8[%c5, %c0_34, %c0_35] : memref<9x1x512xf32, #tpu.memory_space<vmem>>, vector<1x1x512xf32>
    %41 = vector.shape_cast %40 : vector<1x1x512xf32> to vector<1x512xf32>
    %42 = vector.broadcast %41 : vector<1x512xf32> to vector<16x512xf32>
    %43 = arith.mulf %39, %42 : vector<16x512xf32>
    %c80 = arith.constant 80 : index
    %c0_36 = arith.constant 0 : index
    %44 = vector.load %arg11[%c80, %c0_36] : memref<144x512xf32, #tpu.memory_space<vmem>>, vector<16x512xf32>
    tpu.vector_store %arg11[%c80, %c0_36], %43 {strides = array<i32>} : memref<144x512xf32, #tpu.memory_space<vmem>>, vector<16x512xf32>,
    %c0_37 = arith.constant 0 : index
    %c143 = arith.constant 143 : index
    %45 = vector.load %arg10[%c0_37, %c143] : memref<16x768xf32, #tpu.memory_space<vmem>>, vector<16x512xf32>
    %c6 = arith.constant 6 : index
    %c0_38 = arith.constant 0 : index
    %c0_39 = arith.constant 0 : index
    %46 = vector.load %arg8[%c6, %c0_38, %c0_39] : memref<9x1x512xf32, #tpu.memory_space<vmem>>, vector<1x1x512xf32>
    %47 = vector.shape_cast %46 : vector<1x1x512xf32> to vector<1x512xf32>
    %48 = vector.broadcast %47 : vector<1x512xf32> to vector<16x512xf32>
    %49 = arith.mulf %45, %48 : vector<16x512xf32>
    %c96 = arith.constant 96 : index
    %c0_40 = arith.constant 0 : index
    %50 = vector.load %arg11[%c96, %c0_40] : memref<144x512xf32, #tpu.memory_space<vmem>>, vector<16x512xf32>
    tpu.vector_store %arg11[%c96, %c0_40], %49 {strides = array<i32>} : memref<144x512xf32, #tpu.memory_space<vmem>>, vector<16x512xf32>,
    %c0_41 = arith.constant 0 : index
    %c144 = arith.constant 144 : index
    %51 = vector.load %arg10[%c0_41, %c144] : memref<16x768xf32, #tpu.memory_space<vmem>>, vector<16x512xf32>
    %c7 = arith.constant 7 : index
    %c0_42 = arith.constant 0 : index
    %c0_43 = arith.constant 0 : index
    %52 = vector.load %arg8[%c7, %c0_42, %c0_43] : memref<9x1x512xf32, #tpu.memory_space<vmem>>, vector<1x1x512xf32>
    %53 = vector.shape_cast %52 : vector<1x1x512xf32> to vector<1x512xf32>
    %54 = vector.broadcast %53 : vector<1x512xf32> to vector<16x512xf32>
    %55 = arith.mulf %51, %54 : vector<16x512xf32>
    %c112_44 = arith.constant 112 : index
    %c0_45 = arith.constant 0 : index
    %56 = vector.load %arg11[%c112_44, %c0_45] : memref<144x512xf32, #tpu.memory_space<vmem>>, vector<16x512xf32>
    tpu.vector_store %arg11[%c112_44, %c0_45], %55 {strides = array<i32>} : memref<144x512xf32, #tpu.memory_space<vmem>>, vector<16x512xf32>,
    %c0_46 = arith.constant 0 : index
    %c145 = arith.constant 145 : index
    %57 = vector.load %arg10[%c0_46, %c145] : memref<16x768xf32, #tpu.memory_space<vmem>>, vector<16x512xf32>
    %c8 = arith.constant 8 : index
    %c0_47 = arith.constant 0 : index
    %c0_48 = arith.constant 0 : index
    %58 = vector.load %arg8[%c8, %c0_47, %c0_48] : memref<9x1x512xf32, #tpu.memory_space<vmem>>, vector<1x1x512xf32>
    %59 = vector.shape_cast %58 : vector<1x1x512xf32> to vector<1x512xf32>
    %60 = vector.broadcast %59 : vector<1x512xf32> to vector<16x512xf32>
    %61 = arith.mulf %57, %60 : vector<16x512xf32>
    %c128_49 = arith.constant 128 : index
    %c0_50 = arith.constant 0 : index
    %62 = vector.load %arg11[%c128_49, %c0_50] : memref<144x512xf32, #tpu.memory_space<vmem>>, vector<16x512xf32>
    tpu.vector_store %arg11[%c128_49, %c0_50], %61 {strides = array<i32>} : memref<144x512xf32, #tpu.memory_space<vmem>>, vector<16x512xf32>,
    %c0_51 = arith.constant 0 : index
    %c0_52 = arith.constant 0 : index
    %63 = vector.load %arg4[%c0_51, %c0_52] : memref<16x144xf32, #tpu.memory_space<vmem>>, vector<16x144xf32>
    %c0_53 = arith.constant 0 : index
    %c0_54 = arith.constant 0 : index
    %64 = vector.load %arg11[%c0_53, %c0_54] : memref<144x512xf32, #tpu.memory_space<vmem>>, vector<144x512xf32>
    %cst_55 = arith.constant dense<0.000000e+00> : vector<16x512xf32>
    %65 = tpu.matmul %63, %64, %cst_55 {dimension_numbers = #tpu.dot_dimension_numbers<[1], [0], [0], [1], [0, 0, 1, 1], [], []>} : vector<16x144xf32>, vector<144x512xf32>, vector<16x512xf32> -> vector<16x512xf32>
    %c0_56 = arith.constant 0 : index
    %c0_57 = arith.constant 0 : index
    %66 = vector.load %arg5[%c0_56, %c0_57] : memref<16x1xf32, #tpu.memory_space<vmem>>, vector<16x1xf32>
    %67 = vector.broadcast %66 : vector<16x1xf32> to vector<16x512xf32>
    %68 = arith.addf %65, %67 : vector<16x512xf32>
    %cst_58 = arith.constant 0.000000e+00 : f32
    %69 = vector.broadcast %cst_58 : f32 to vector<16x512xf32>
    %70 = arith.maximumf %68, %69 : vector<16x512xf32>
    %c0_59 = arith.constant 0 : index
    %c0_60 = arith.constant 0 : index
    %71 = vector.load %arg6[%c0_59, %c0_60] : memref<32x16xf32, #tpu.memory_space<vmem>>, vector<32x16xf32>
    %cst_61 = arith.constant dense<0.000000e+00> : vector<32x512xf32>
    %72 = tpu.matmul %71, %70, %cst_61 {dimension_numbers = #tpu.dot_dimension_numbers<[1], [0], [0], [1], [0, 0, 1, 1], [], []>} : vector<32x16xf32>, vector<16x512xf32>, vector<32x512xf32> -> vector<32x512xf32>
    %c0_62 = arith.constant 0 : index
    %c0_63 = arith.constant 0 : index
    %73 = vector.load %arg7[%c0_62, %c0_63] : memref<32x1xf32, #tpu.memory_space<vmem>>, vector<32x1xf32>
    %74 = vector.broadcast %73 : vector<32x1xf32> to vector<32x512xf32>
    %75 = arith.addf %72, %74 : vector<32x512xf32>
    %76 = arith.addf %75, %4 : vector<32x512xf32>
    %cst_64 = arith.constant 0.000000e+00 : f32
    %77 = vector.broadcast %cst_64 : f32 to vector<32x512xf32>
    %78 = arith.maximumf %76, %77 : vector<32x512xf32>
    %c0_65 = arith.constant 0 : index
    %c0_66 = arith.constant 0 : index
    %79 = vector.load %arg9[%c0_65, %c0_66] : memref<32x512xf32, #tpu.memory_space<vmem>>, vector<32x512xf32>
    tpu.vector_store %arg9[%c0_65, %c0_66], %78 {strides = array<i32>} : memref<32x512xf32, #tpu.memory_space<vmem>>, vector<32x512xf32>,
    return
  }
  func.func @transform_0(%arg0: i32) -> (i32, i32) {
    %c0_i32 = arith.constant 0 : i32
    %c0_i32_0 = arith.constant 0 : i32
    return %c0_i32, %arg0 : i32, i32
  }
  func.func @transform_1(%arg0: i32) -> (i32, i32) {
    %c0_i32 = arith.constant 0 : i32
    %c0_i32_0 = arith.constant 0 : i32
    %c0_i32_1 = arith.constant 0 : i32
    return %c0_i32, %c0_i32_0 : i32, i32
  }
  func.func @transform_2(%arg0: i32) -> (i32, i32) {
    %c0_i32 = arith.constant 0 : i32
    %c0_i32_0 = arith.constant 0 : i32
    %c0_i32_1 = arith.constant 0 : i32
    return %c0_i32, %c0_i32_0 : i32, i32
  }
  func.func @transform_3(%arg0: i32) -> (i32, i32) {
    %c0_i32 = arith.constant 0 : i32
    %c0_i32_0 = arith.constant 0 : i32
    %c0_i32_1 = arith.constant 0 : i32
    return %c0_i32, %c0_i32_0 : i32, i32
  }
  func.func @transform_4(%arg0: i32) -> (i32, i32) {
    %c0_i32 = arith.constant 0 : i32
    %c0_i32_0 = arith.constant 0 : i32
    %c0_i32_1 = arith.constant 0 : i32
    return %c0_i32, %c0_i32_0 : i32, i32
  }
  func.func @transform_5(%arg0: i32) -> (i32, i32) {
    %c0_i32 = arith.constant 0 : i32
    %c0_i32_0 = arith.constant 0 : i32
    %c0_i32_1 = arith.constant 0 : i32
    return %c0_i32, %c0_i32_0 : i32, i32
  }
  func.func @transform_6(%arg0: i32) -> (i32, i32) {
    %c0_i32 = arith.constant 0 : i32
    %c0_i32_0 = arith.constant 0 : i32
    %c0_i32_1 = arith.constant 0 : i32
    return %c0_i32, %c0_i32_0 : i32, i32
  }
  func.func @transform_7(%arg0: i32) -> (i32, i32, i32) {
    %c0_i32 = arith.constant 0 : i32
    %c0_i32_0 = arith.constant 0 : i32
    %c0_i32_1 = arith.constant 0 : i32
    %c0_i32_2 = arith.constant 0 : i32
    return %c0_i32, %c0_i32_0, %c0_i32_1 : i32, i32, i32
  }
  func.func @transform_8(%arg0: i32) -> (i32, i32) {
    %c0_i32 = arith.constant 0 : i32
    %c0_i32_0 = arith.constant 0 : i32
    return %c0_i32, %arg0 : i32, i32
  }
}

</mosaic_0001>

<bundles_post_ra>
// kernel: tpu_custom_call.1
= control target key start
LH: loop header
LB: loop body
LE: loop exit
PB: predicated region body
PF: predicated region fallthrough
CT: control target
= control target key end

     0   :  { %13 = vsyncpa [#allocation5], 0  ;;  %s2616_s0 = inlined_call_operand.hbm [shape: f32[32,512], index: 0, kind: input, shape index: {}]   ;;  %s2617_s1 = inlined_call_operand.vmem [shape: f32[16,32], index: 1, kind: input, shape index: {}]   ;;  %s2618_s2 = inlined_call_operand.vmem [shape: f32[16,1], index: 2, kind: input, shape index: {}]   ;;  %s2619_s3 = inlined_call_operand.vmem [shape: f32[16,144], index: 3, kind: input, shape index: {}]   ;;  %s2620_s4 = inlined_call_operand.vmem [shape: f32[16,1], index: 4, kind: input, shape index: {}]   ;;  %s2621_s5 = inlined_call_operand.vmem [shape: f32[32,16], index: 5, kind: input, shape index: {}]   ;;  %s2622_s6 = inlined_call_operand.vmem [shape: f32[32,1], index: 6, kind: input, shape index: {}]   ;;  %s2623_s7 = inlined_call_operand.vmem [shape: f32[9,1,512], index: 7, kind: input, shape index: {}]   ;;  %s2624_s8 = inlined_call_operand.hbm [shape: f32[32,512], index: 8, kind: output, shape index: {}]  }
   0x1   :  { %14 = vsyncpa [#allocation6], 0  ;;  %s1788_s27 = smov [#allocation4]  }
   0x2   :  { %s20_s28 = sshll.u32 %s1788_s27, 4  ;;  %s21_s28 = int_to_ptr.vmem [resolvable:$true] %s20_s28 }
   0x3   :  { %s1752_s29 = scalar_lea.vmem %s21_s28, 2048  ;;  %p1757_p1 = scmp.lt.s32.totalorder %s21_s28, %s21_s28 }
   0x4   :  { %p1753_p0 = scmp.ne.s32.totalorder %s21_s28, %s1752_s29  ;;  %p1758_p2 = scmp.lt.s32.totalorder %s1752_s29, %s1752_s29 }
   0x6   :  { %p1759_p3 = por %p1758_p2, %p1757_p1 }
   0x8   :  { %p1760_p4 = pnand %p1759_p3, %p1753_p0 }
   0xa   :  { %1763 = shalt.err (!%p1760_p4)
}
   0xb   :  { %s1789_s30 = smov 512   ;;  %s1790_s9 = smov 32  }
   0xc   :  { %26 = dma.hbm_to_vmem [thread:$0]  %s2616_s0, 2048, %s21_s28, [#allocation5], %s1789_s30, %s1789_s30, %s1790_s9  }
   0xd   :  { %1784 = dma.done.wait [#allocation5], 2048  }
   0xe   :  { %1785 = vsyncadd [#allocation5], 4294965248  ;;  %v2625_v0 = vmov 0.0   ;;  %v1792_v1 = vmov 0   ;;  %v267_v2 = vlaneseq  ;;  %v61_v4 = vld [vmem:[#allocation4 + $0x68] sm:$0xff]  ;;  %v63_v5 = vld [vmem:[#allocation4 + $0x78] sm:$0xff] }
   0xf   :  { %149 = vmatprep.mubr.f32.mxu0 %v2625_v0  ;;  %226 = vmatprep.mubr.f32.mxu1 %v2625_v0  ;;  %v60_v6 = vld [vmem:[#allocation4 + $0x60] sm:$0xff]  ;;  %v62_v7 = vld [vmem:[#allocation4 + $0x70] sm:$0xff]  ;;  %v57_v8 = vld [vmem:[#allocation4 + $0x48] sm:$0xff]  ;;  %vm78_vm0 = vcmask 261120   ;;  %s1793_s19 = smov 16   ;;  %s1795_s25 = smov 1  }
  0x10   :  { %1726 = vset.pattern.permute.xlu0 %v1792_v1  ;;  %1727 = vset.pattern.permute.xlu1 %v1792_v1  ;;  %v268_v3 = vshrl.u32 %v267_v2, 7  ;;  %v59_v9 = vld [vmem:[#allocation4 + $0x58] sm:$0xff]  ;;  %v56_v10 = vld [vmem:[#allocation4 + $0x40] sm:$0xff]  ;;  %v58_v11 = vld [vmem:[#allocation4 + $0x50] sm:$0xff]  ;;  %s1796_s28 = smov 127   ;;  %s1797_s11 = smov 113  }
  0x11   :  { %109 = vmatprep.subr.mxu0 %v61_v4  ;;  %186 = vmatprep.subr.mxu1 %v63_v5  ;;  %v53_v12 = vld [vmem:[#allocation4 + $0x28] sm:$0xff]  ;;  %v55_v13 = vld [vmem:[#allocation4 + $0x38] sm:$0xff]  ;;  %v52_v14 = vld [vmem:[#allocation4 + $0x20] sm:$0xff]  ;;  %s1798_s13 = smov 112   ;;  %s1799_s16 = smov 111   ;;  %vm451_vm1 = vcmask 130048  }
  0x12   :  { %110 = vmatpush1.msra.mxu0 %v60_v6  ;;  %187 = vmatpush1.msra.mxu1 %v62_v7  ;;  %v54_v15 = vld [vmem:[#allocation4 + $0x30] sm:$0xff]  ;;  %v1855_v16 = vsub.s32 0, %v268_v3  ;;  %v49_v17 = vld [vmem:[#allocation4 + $0x8] sm:$0xff]  ;;  %v51_v18 = vld [vmem:[#allocation4 + $0x18] sm:$0xff]  ;;  %v1864_v24 = vsub.s32 1, %v268_v3  ;;  %v1878_v28 = vsub.s32 2, %v268_v3 }
  0x13   :  { %111 = vmatprep.subr.mxu0 %v57_v8  ;;  %188 = vmatprep.subr.mxu1 %v59_v9  ;;  %v48_v19 = vld [vmem:[#allocation4] sm:$0xff]  ;;  %v50_v20 = vld [vmem:[#allocation4 + $0x10] sm:$0xff]  ;;  %v1698_v22 = vld [vmem:[%s2623_s7 + $0x1c] sm:$0xf]  ;;  %v1880_v29 = vsub.s32 3, %v268_v3  ;;  %s1800_s20 = smov 17  }
  0x14   :  { %112 = vmatpush1.msra.mxu0 %v56_v10  ;;  %189 = vmatpush1.msra.mxu1 %v58_v11  ;;  %v64_v21 = vld [vmem:[%s2617_s1] sm:$0xff]  ;;  %v948_v23 = vrot.slane %v1698_v22, %v1855_v16  ;;  %v67_v25 = vld [vmem:[%s2618_s2 + $0x8] sm:$0xff]  ;;  %v952_v27 = vrot.slane %v1698_v22, %v1864_v24  ;;  %v956_v31 = vrot.slane %v1698_v22, %v1878_v28  ;;  %v1697_v33 = vld [vmem:[%s2623_s7 + $0x18] sm:$0xf]  ;;  %vm562_vm2 = vcmask 121856  }
  0x15   :  { %113 = vmatprep.subr.mxu0 %v53_v12  ;;  %190 = vmatprep.subr.mxu1 %v55_v13  ;;  %v65_v26 = vld [vmem:[%s2617_s1 + $0x8] sm:$0xff]  ;;  %v66_v30 = vld [vmem:[%s2618_s2] sm:$0xff]  ;;  %v960_v32 = vrot.slane %v1698_v22, %v1880_v29  ;;  %v839_v34 = vrot.slane %v1697_v33, %v1855_v16  ;;  %v843_v35 = vrot.slane %v1697_v33, %v1864_v24  ;;  %s1794_s2 = smov 15   ;;  %v1696_v38 = vld [vmem:[%s2623_s7 + $0x14] sm:$0xf]  ;;  %vm673_vm3 = vcmask 7168  }
  0x16   :  { %114 = vmatpush1.msra.mxu0 %v52_v14  ;;  %191 = vmatpush1.msra.mxu1 %v54_v15  ;;  %v847_v36 = vrot.slane %v1697_v33, %v1878_v28  ;;  %v851_v37 = vrot.slane %v1697_v33, %v1880_v29  ;;  %v730_v39 = vrot.slane %v1696_v38, %v1855_v16  ;;  %v1695_v43 = vld [vmem:[%s2623_s7 + $0xc] sm:$0xf]  ;;  %v1694_v48 = vld [vmem:[%s2623_s7 + $0x8] sm:$0xf]  ;;  %v1693_v53 = vld [vmem:[%s2623_s7 + $0x4] sm:$0xf] }
  0x17   :  { %115 = vmatprep.subr.mxu0 %v49_v17  ;;  %192 = vmatprep.subr.mxu1 %v51_v18  ;;  %v734_v40 = vrot.slane %v1696_v38, %v1864_v24  ;;  %v738_v41 = vrot.slane %v1696_v38, %v1878_v28  ;;  %v742_v42 = vrot.slane %v1696_v38, %v1880_v29  ;;  %v265_v58 = vld [vmem:[%s2623_s7] sm:$0xf]  ;;  %vm624_vm4 = vcmask 1039360  }
  0x18   :  { %116 = vmatpush1.msra.mxu0 %v48_v19  ;;  %193 = vmatpush1.msra.mxu1 %v50_v20  ;;  %v603_v44 = vrot.slane %v1695_v43, %v1855_v16  ;;  %v607_v45 = vrot.slane %v1695_v43, %v1864_v24  ;;  %v611_v46 = vrot.slane %v1695_v43, %v1878_v28  ;;  %v1699_v63 = vld [vmem:[%s2623_s7 + $0x20] sm:$0xf]  ;;  %vm513_vm5 = vcmask 924672  }
  0x19   :  { %1689 = vmatmul.mubr.msk.f32.vlgmr.msra.gmra.mxu0 %vm78_vm0, %v64_v21  ;;  %1691 = vmatmul.mubr.msk.f32.vlgmr.msra.gmra.mxu1 %vm78_vm0, %v64_v21  ;;  %v615_v47 = vrot.slane %v1695_v43, %v1880_v29  ;;  %v492_v49 = vrot.slane %v1694_v48, %v1855_v16  ;;  %v496_v50 = vrot.slane %v1694_v48, %v1864_v24  ;;  %vm402_vm6 = vcmask 916480  }
  0x1a   :  { %155 = vmatprep.mubr.f32.mxu0 %v2625_v0  ;;  %232 = vmatprep.mubr.f32.mxu1 %v2625_v0  ;;  %v500_v51 = vrot.slane %v1694_v48, %v1878_v28  ;;  %v504_v52 = vrot.slane %v1694_v48, %v1880_v29  ;;  %v381_v54 = vrot.slane %v1693_v53, %v1855_v16  ;;  %vm291_vm7 = vcmask 908288  }
  0x1b   :  { %75 = vperm.xlu0 %1726, %v67_v25   ;;  %961 = vrot.lane.b32.xlu1 %v948_v23, %s1793_s19  ;;  %v385_v55 = vrot.slane %v1693_v53, %v1864_v24  ;;  %v389_v56 = vrot.slane %v1693_v53, %v1878_v28  ;;  %v393_v57 = vrot.slane %v1693_v53, %v1880_v29  ;;  %vm340_vm8 = vcmask 138240  }
  0x1c   :  { %v270_v59 = vrot.slane %v265_v58, %v1855_v16  ;;  %v274_v60 = vrot.slane %v265_v58, %v1864_v24  ;;  %v278_v61 = vrot.slane %v265_v58, %v1878_v28  ;;  %v282_v62 = vrot.slane %v265_v58, %v1880_v29 }
  0x1d   :  { %1690 = vmatmul.mubr.msk.f32.gmra.mxu0 %vm78_vm0, %v65_v26  ;;  %1692 = vmatmul.mubr.msk.f32.gmra.mxu1 %vm78_vm0, %v65_v26  ;;  %v1057_v1 = vrot.slane %v1699_v63, %v1855_v16  ;;  %v1061_v2 = vrot.slane %v1699_v63, %v1864_v24  ;;  %v1065_v3 = vrot.slane %v1699_v63, %v1878_v28 }
  0x1e   :  { %v1069_v4 = vrot.slane %v1699_v63, %v1880_v29 }
  0x1f   :  { %70 = vperm.xlu0 %1726, %v66_v30   ;;  %963 = vrot.lane.b32.xlu1 %v952_v27, %s1793_s19 }
  0x23   :  { %965 = vrot.lane.b32.xlu0 %v956_v31, %s1793_s19  ;;  %967 = vrot.lane.b32.xlu1 %v960_v32, %s1793_s19 }
  0x27   :  { %852 = vrot.lane.b32.xlu0 %v839_v34, %s1794_s2  ;;  %854 = vrot.lane.b32.xlu1 %v843_v35, %s1794_s2 }
  0x2b   :  { %856 = vrot.lane.b32.xlu0 %v847_v36, %s1794_s2  ;;  %858 = vrot.lane.b32.xlu1 %v851_v37, %s1794_s2 }
  0x2f   :  { %743 = vrot.lane.b32.xlu0 %v730_v39, %s1795_s25  ;;  %745 = vrot.lane.b32.xlu1 %v734_v40, %s1795_s25 }
  0x33   :  { %747 = vrot.lane.b32.xlu0 %v738_v41, %s1795_s25  ;;  %749 = vrot.lane.b32.xlu1 %v742_v42, %s1795_s25 }
  0x37   :  { %616 = vrot.lane.b32.xlu0 %v603_v44, %s1796_s28  ;;  %618 = vrot.lane.b32.xlu1 %v607_v45, %s1796_s28 }
  0x3b   :  { %620 = vrot.lane.b32.xlu0 %v611_v46, %s1796_s28  ;;  %622 = vrot.lane.b32.xlu1 %v615_v47, %s1796_s28 }
  0x3f   :  { %505 = vrot.lane.b32.xlu0 %v492_v49, %s1797_s11  ;;  %507 = vrot.lane.b32.xlu1 %v496_v50, %s1797_s11 }
  0x43   :  { %509 = vrot.lane.b32.xlu0 %v500_v51, %s1797_s11  ;;  %511 = vrot.lane.b32.xlu1 %v504_v52, %s1797_s11 }
  0x47   :  { %394 = vrot.lane.b32.xlu0 %v381_v54, %s1798_s13  ;;  %396 = vrot.lane.b32.xlu1 %v385_v55, %s1798_s13 }
  0x4b   :  { %398 = vrot.lane.b32.xlu0 %v389_v56, %s1798_s13  ;;  %400 = vrot.lane.b32.xlu1 %v393_v57, %s1798_s13 }
  0x4f   :  { %283 = vrot.lane.b32.xlu0 %v270_v59, %s1799_s16  ;;  %285 = vrot.lane.b32.xlu1 %v274_v60, %s1799_s16 }
  0x53   :  { %287 = vrot.lane.b32.xlu0 %v278_v61, %s1799_s16  ;;  %289 = vrot.lane.b32.xlu1 %v282_v62, %s1799_s16 }
  0x57   :  { %1070 = vrot.lane.b32.xlu0 %v1057_v1, %s1800_s20  ;;  %1072 = vrot.lane.b32.xlu1 %v1061_v2, %s1800_s20 }
  0x5b   :  { %1074 = vrot.lane.b32.xlu0 %v1065_v3, %s1800_s20  ;;  %1076 = vrot.lane.b32.xlu1 %v1069_v4, %s1800_s20 }
  0x8d   :  { %v1969_v5 = vpop.permute.xlu1 %961 }
  0x91   :  { %v1971_v6 = vpop.permute.xlu1 %963 }
  0x95   :  { %v1973_v7 = vpop.permute.xlu1 %967 }
  0x96   :  { %v1975_v8 = vpop.permute.xlu0 %75  ;;  %v981_v9 = vmul.f32 0.0, %v1973_v7 }
  0x98   :  { %1015 = vrot.lane.b32.xlu1 %v981_v9, %s1798_s13  ;;  %1005 = vrot.lane.b32.xlu0 %v981_v9, %s1798_s13 }
  0x99   :  { %v1980_v10 = vpop.permute.xlu1 %854 }
  0x9a   :  { %v71_v11 = vpop.permute.xlu0 %70 }
  0x9d   :  { %v1982_v12 = vpop.permute.xlu1 %858 }
  0x9e   :  { %v1984_v13 = vpop.permute.xlu0 %965  ;;  %v872_v14 = vmul.f32 0.0, %v1982_v12 }
  0x9f   :  { %v2031_v40 = vsel %vm451_vm1, %v1971_v6, %v1984_v13 }
  0xa0   :  { %906 = vrot.lane.b32.xlu1 %v872_v14, %s1797_s11  ;;  %896 = vrot.lane.b32.xlu0 %v872_v14, %s1797_s11 }
  0xa1   :  { %v1989_v15 = vpop.permute.xlu1 %745 }
  0xa2   :  { %v1991_v16 = vpop.permute.xlu0 %852 }
  0xa5   :  { %v1993_v17 = vpop.permute.xlu1 %749 }
  0xa6   :  { %v1995_v18 = vpop.permute.xlu0 %856  ;;  %v763_v19 = vmul.f32 0.0, %v1993_v17 }
  0xa7   :  { %v2044_v45 = vsel %vm562_vm2, %v1980_v10, %v1995_v18 }
  0xa8   :  { %797 = vrot.lane.b32.xlu1 %v763_v19, %s1796_s28  ;;  %787 = vrot.lane.b32.xlu0 %v763_v19, %s1796_s28 }
  0xa9   :  { %v619_v37 = vpop.permute.xlu1 %618 }
  0xaa   :  { %v2000_v20 = vpop.permute.xlu0 %743 }
  0xad   :  { %v2037_v44 = vpop.permute.xlu1 %622 }
  0xae   :  { %v2002_v21 = vpop.permute.xlu0 %747 }
  0xaf   :  { %v2055_v50 = vsel %vm673_vm3, %v1989_v15, %v2002_v21 }
  0xb1   :  { %v508_v51 = vpop.permute.xlu1 %507 }
  0xb2   :  { %v617_v22 = vpop.permute.xlu0 %616 }
  0xb3   :  { %v633_v23 = vmul.f32 0.0, %v617_v22  ;;  %v2066_v56 = vsel %vm624_vm4, %v617_v22, %v619_v37 }
  0xb5   :  { %653 = vrot.lane.b32.xlu1 %v633_v23, %s1795_s25  ;;  %663 = vrot.lane.b32.xlu0 %v633_v23, %s1795_s25  ;;  %v2077_v61 = vpop.permute.xlu1 %511 }
  0xb6   :  { %v621_v24 = vpop.permute.xlu0 %620 }
  0xb7   :  { %v2069_v57 = vsel %vm624_vm4, %v619_v37, %v621_v24  ;;  %v627_v62 = vsel %vm624_vm4, %v621_v24, %v2037_v44 }
  0xb9   :  { %v397_v4 = vpop.permute.xlu1 %396 }
  0xba   :  { %v506_v25 = vpop.permute.xlu0 %505 }
  0xbb   :  { %v522_v26 = vmul.f32 0.0, %v506_v25  ;;  %v514_v2 = vsel %vm513_vm5, %v506_v25, %v508_v51 }
  0xbd   :  { %542 = vrot.lane.b32.xlu1 %v522_v26, %s1794_s2  ;;  %552 = vrot.lane.b32.xlu0 %v522_v26, %s1794_s2  ;;  %v2104_v24 = vpop.permute.xlu1 %400 }
  0xbe   :  { %v2008_v27 = vpop.permute.xlu0 %509 }
  0xbf   :  { %v2091_v3 = vsel %vm513_vm5, %v508_v51, %v2008_v27  ;;  %v516_v14 = vsel %vm513_vm5, %v2008_v27, %v2077_v61  ;;  %v2166_v51 = vsel %vm562_vm2, %v1991_v16, %v1980_v10 }
  0xc2   :  { %v2010_v28 = vpop.permute.xlu0 %394 }
  0xc3   :  { %v411_v29 = vmul.f32 0.0, %v2010_v28  ;;  %v403_v25 = vsel %vm402_vm6, %v2010_v28, %v397_v4 }
  0xc5   :  { %431 = vrot.lane.b32.xlu1 %v411_v29, %s1793_s19  ;;  %441 = vrot.lane.b32.xlu0 %v411_v29, %s1793_s19 }
  0xc6   :  { %v2015_v30 = vpop.permute.xlu0 %398 }
  0xc7   :  { %v2112_v26 = vsel %vm402_vm6, %v397_v4, %v2015_v30  ;;  %v405_v28 = vsel %vm402_vm6, %v2015_v30, %v2104_v24 }
  0xca   :  { %v2017_v31 = vpop.permute.xlu0 %283 }
  0xcb   :  { %v2020_v32 = vmul.f32 0.0, %v2017_v31 }
  0xcd   :  { %330 = vrot.lane.b32.xlu0 %v2020_v32, %s1800_s20 }
  0xd9   :  { %v151_v33 = vpop.f32.mrf.mxu0  ;;  %v228_v34 = vpop.f32.mrf.mxu1 }
  0xda   :  { %v152_v35 = vadd.f32 %v151_v33, %v71_v11  ;;  %v229_v36 = vadd.f32 %v228_v34, %v71_v11  ;;  %v2123_v34 = vpop.permute.xlu1 %285 }
  0xdb   :  { %v153_v43 = vpop.f32.mrf.mxu0  ;;  %v230_v49 = vpop.f32.mrf.mxu1 }
  0xdc   :  { %v2024_v38 = vmax.f32 %v152_v35, 0.0  ;;  %v2026_v39 = vmax.f32 %v229_v36, 0.0  ;;  %v154_v46 = vadd.f32 %v153_v43, %v71_v11  ;;  %v231_v53 = vadd.f32 %v230_v49, %v71_v11 }
  0xdd   :  { %v157_v23 = vpop.f32.mrf.mxu0  ;;  %v2143_v43 = vsel %vm451_vm1, %v1969_v5, %v1971_v6 }
  0xde   :  { %v979_v41 = vmul.f32 %v2031_v40, %v2026_v39  ;;  %v977_v42 = vmul.f32 %v1969_v5, %v2024_v38  ;;  %v870_v47 = vmul.f32 %v2044_v45, %v2026_v39  ;;  %v868_v48 = vmul.f32 %v1991_v16, %v2024_v38 }
  0xdf   :  { %v2057_v52 = vmax.f32 %v154_v46, 0.0  ;;  %v761_v54 = vmul.f32 %v2055_v50, %v2026_v39  ;;  %v759_v55 = vmul.f32 %v2000_v20, %v2024_v38  ;;  %v2071_v58 = vmax.f32 %v231_v53, 0.0 }
  0xe0   :  { %1001 = vrot.lane.b32.xlu0 %v979_v41, %s1798_s13  ;;  %997 = vrot.lane.b32.xlu1 %v977_v42, %s1798_s13  ;;  %v634_v60 = vmul.f32 %v2066_v56, %v2024_v38  ;;  %v636_v1 = vmul.f32 %v627_v62, %v2026_v39  ;;  %v523_v11 = vmul.f32 %v514_v2, %v2024_v38 }
  0xe1   :  { %v635_v59 = vmul.f32 %v2069_v57, %v2057_v52  ;;  %v637_v63 = vmul.f32 %v2037_v44, %v2071_v58  ;;  %v524_v9 = vmul.f32 %v2091_v3, %v2057_v52  ;;  %v526_v19 = vmul.f32 %v2077_v61, %v2071_v58 }
  0xe2   :  { %v525_v22 = vmul.f32 %v516_v14, %v2026_v39  ;;  %v158_v27 = vadd.f32 %v157_v23, %v1975_v8  ;;  %v413_v29 = vmul.f32 %v2112_v26, %v2057_v52  ;;  %v412_v33 = vmul.f32 %v403_v25, %v2024_v38 }
  0xe3   :  { %v415_v36 = vmul.f32 %v2104_v24, %v2071_v58  ;;  %v414_v37 = vmul.f32 %v405_v28, %v2026_v39  ;;  %v292_v41 = vsel %vm291_vm7, %v2017_v31, %v2123_v34  ;;  %v978_v46 = vmul.f32 %v2143_v43, %v2057_v52 }
  0xe4   :  { %892 = vrot.lane.b32.xlu0 %v870_v47, %s1797_s11  ;;  %888 = vrot.lane.b32.xlu1 %v868_v48, %s1797_s11  ;;  %v2125_v35 = vmax.f32 %v158_v27, 0.0  ;;  %v301_v42 = vmul.f32 %v292_v41, %v2024_v38  ;;  %v234_v47 = vpop.f32.mrf.mxu1  ;;  %v2154_v48 = vsel %vm451_vm1, %v1984_v13, %v1973_v7  ;;  %v869_v13 = vmul.f32 %v2166_v51, %v2057_v52 }
  0xe5   :  { %v235_v49 = vadd.f32 %v234_v47, %v1975_v8  ;;  %v980_v6 = vmul.f32 %v2154_v48, %v2071_v58 }
  0xe6   :  { %v982_v30 = vmul.f32 %v1969_v5, %v2125_v35  ;;  %v873_v31 = vmul.f32 %v1991_v16, %v2125_v35  ;;  %v764_v5 = vmul.f32 %v2000_v20, %v2125_v35  ;;  %v639_v7 = vmul.f32 %v2066_v56, %v2125_v35 }
  0xe7   :  { %v2168_v53 = vmax.f32 %v235_v49, 0.0  ;;  %v528_v56 = vmul.f32 %v514_v2, %v2125_v35  ;;  %v2218_v2 = vpop.permute.xlu1 %289  ;;  %v306_v4 = vmul.f32 %v292_v41, %v2125_v35 }
  0xe8   :  { %783 = vrot.lane.b32.xlu0 %v761_v54, %s1796_s28  ;;  %779 = vrot.lane.b32.xlu1 %v759_v55, %s1796_s28  ;;  %v2179_v54 = vsel %vm562_vm2, %v1995_v18, %v1982_v12  ;;  %v2189_v55 = vsel %vm673_vm3, %v2000_v20, %v1989_v15  ;;  %v2199_v18 = vsel %vm673_vm3, %v2002_v21, %v1993_v17  ;;  %v2204_v20 = vpop.permute.xlu0 %287 }
  0xe9   :  { %v641_v10 = vmul.f32 %v627_v62, %v2168_v53  ;;  %v871_v16 = vmul.f32 %v2179_v54, %v2071_v58  ;;  %v760_v12 = vmul.f32 %v2189_v55, %v2057_v52  ;;  %v762_v15 = vmul.f32 %v2199_v18, %v2071_v58 }
  0xea   :  { %v984_v62 = vmul.f32 %v2031_v40, %v2168_v53  ;;  %v419_v21 = vmul.f32 %v405_v28, %v2168_v53 }
  0xec   :  { %657 = vrot.lane.b32.xlu0 %v635_v59, %s1795_s25  ;;  %655 = vrot.lane.b32.xlu1 %v634_v60, %s1795_s25  ;;  %v530_v59 = vmul.f32 %v516_v14, %v2168_v53  ;;  %v417_v60 = vmul.f32 %v403_v25, %v2125_v35  ;;  %v2213_v17 = vpop.permute.xlu0 %1070  ;;  %v236_v14 = vpop.f32.mrf.mxu1 }
  0xed   :  { %v237_v23 = vadd.f32 %v236_v14, %v1975_v8 }
  0xf0   :  { %661 = vrot.lane.b32.xlu0 %v637_v63, %s1795_s25  ;;  %659 = vrot.lane.b32.xlu1 %v636_v1, %s1795_s25  ;;  %v875_v63 = vmul.f32 %v2044_v45, %v2168_v53  ;;  %v159_v1 = vpop.f32.mrf.mxu0  ;;  %v2229_v45 = vpop.permute.xlu0 %1074 }
  0xf1   :  { %v160_v40 = vadd.f32 %v159_v1, %v1975_v8 }
  0xf4   :  { %546 = vrot.lane.b32.xlu0 %v524_v9, %s1794_s2  ;;  %544 = vrot.lane.b32.xlu1 %v523_v11, %s1794_s2  ;;  %v766_v9 = vmul.f32 %v2055_v50, %v2168_v53  ;;  %v294_v11 = vsel %vm291_vm7, %v2204_v20, %v2218_v2 }
  0xf5   :  { %v308_v25 = vmul.f32 %v294_v11, %v2168_v53  ;;  %v303_v50 = vmul.f32 %v294_v11, %v2026_v39 }
  0xf8   :  { %550 = vrot.lane.b32.xlu0 %v526_v19, %s1794_s2  ;;  %548 = vrot.lane.b32.xlu1 %v525_v22, %s1794_s2  ;;  %v1073_v19 = vpop.permute.xlu1 %1072  ;;  %v2233_v22 = vmax.f32 %v160_v40, 0.0  ;;  %v1151_v40 = vld [vmem:[%s2619_s3 + $0x8] sm:$0xff] }
  0xf9   :  { %v1079_v8 = vsel %vm340_vm8, %v1073_v19, %v2229_v45  ;;  %1702 = vmatprep.mubr.msk.f32.mxu1 %vm451_vm1, %v1151_v40  ;;  %1700 = vmatprep.mubr.msk.f32.mxu0 %vm451_vm1, %v1151_v40 }
  0xfa   :  { %v1093_v41 = vmul.f32 %v1079_v8, %v2168_v53 }
  0xfc   :  { %435 = vrot.lane.b32.xlu0 %v413_v29, %s1793_s19  ;;  %433 = vrot.lane.b32.xlu1 %v412_v33, %s1793_s19  ;;  %v2242_v29 = vmax.f32 %v237_v23, 0.0  ;;  %v983_v33 = vmul.f32 %v2143_v43, %v2233_v22  ;;  %v2246_v28 = vpop.permute.xlu1 %1076  ;;  %v1078_v43 = vsel %vm340_vm8, %v2213_v17, %v1073_v19 }
  0xfe   :  { %v876_v47 = vmul.f32 %v2179_v54, %v2242_v29  ;;  %v642_v54 = vmul.f32 %v2037_v44, %v2242_v29  ;;  %v309_v14 = vmul.f32 %v2218_v2, %v2242_v29 }
 0x100   :  { %439 = vrot.lane.b32.xlu0 %v415_v36, %s1793_s19  ;;  %437 = vrot.lane.b32.xlu1 %v414_v37, %s1793_s19  ;;  %v985_v37 = vmul.f32 %v2154_v48, %v2242_v29  ;;  %v1087_v48 = vmul.f32 %v1078_v43, %v2057_v52 }
 0x104   :  { %1007 = vrot.lane.b32.xlu0 %v982_v30, %s1798_s13  ;;  %322 = vrot.lane.b32.xlu1 %v301_v42, %s1800_s20  ;;  %v2259_v30 = vmul.f32 0.0, %v2246_v28 }
 0x108   :  { %898 = vrot.lane.b32.xlu0 %v873_v31, %s1797_s11  ;;  %999 = vrot.lane.b32.xlu1 %v978_v46, %s1798_s13 }
 0x10a   :  { %v2240_v27 = vpop.permute.xlu0 %1005  ;;  %v2261_v42 = vpop.permute.xlu1 %1015 }
 0x10c   :  { %789 = vrot.lane.b32.xlu0 %v764_v5, %s1796_s28  ;;  %1003 = vrot.lane.b32.xlu1 %v980_v6, %s1798_s13  ;;  %v765_v5 = vmul.f32 %v2189_v55, %v2233_v22  ;;  %v640_v6 = vmul.f32 %v2069_v57, %v2233_v22  ;;  %v529_v55 = vmul.f32 %v2091_v3, %v2233_v22 }
 0x110   :  { %665 = vrot.lane.b32.xlu0 %v639_v7, %s1795_s25  ;;  %890 = vrot.lane.b32.xlu1 %v869_v13, %s1797_s11  ;;  %v767_v13 = vmul.f32 %v2199_v18, %v2242_v29 }
 0x112   :  { %v2253_v36 = vpop.permute.xlu0 %896  ;;  %v2274_v46 = vpop.permute.xlu1 %906 }
 0x114   :  { %669 = vrot.lane.b32.xlu0 %v641_v10, %s1795_s25  ;;  %894 = vrot.lane.b32.xlu1 %v871_v16, %s1797_s11  ;;  %v293_v10 = vsel %vm291_vm7, %v2123_v34, %v2204_v20  ;;  %v304_v34 = vmul.f32 %v2218_v2, %v2071_v58  ;;  %v1088_v20 = vmul.f32 %v1079_v8, %v2026_v39  ;;  %v1227_v2 = vld [vmem:[%s2620_s4 + $0x8] sm:$0xff] }
 0x115   :  { %v302_v16 = vmul.f32 %v293_v10, %v2057_v52  ;;  %v307_v1 = vmul.f32 %v293_v10, %v2233_v22  ;;  %v1086_v8 = vmul.f32 %v2213_v17, %v2024_v38 }
 0x118   :  { %554 = vrot.lane.b32.xlu0 %v528_v56, %s1794_s2  ;;  %781 = vrot.lane.b32.xlu1 %v760_v12, %s1796_s28  ;;  %v531_v12 = vmul.f32 %v2077_v61, %v2242_v29 }
 0x11a   :  { %v2269_v31 = vpop.permute.xlu0 %787 }
 0x11c   :  { %558 = vrot.lane.b32.xlu0 %v530_v59, %s1794_s2  ;;  %785 = vrot.lane.b32.xlu1 %v762_v15, %s1796_s28  ;;  %v1091_v59 = vmul.f32 %v2213_v17, %v2125_v35  ;;  %v418_v15 = vmul.f32 %v2112_v26, %v2233_v22 }
 0x120   :  { %443 = vrot.lane.b32.xlu0 %v417_v60, %s1793_s19  ;;  %1011 = vrot.lane.b32.xlu1 %v984_v62, %s1798_s13  ;;  %v420_v62 = vmul.f32 %v2104_v24, %v2242_v29  ;;  %v1080_v24 = vsel %vm340_vm8, %v2229_v45, %v2246_v28 }
 0x121   :  { %v1094_v11 = vmul.f32 %v1080_v24, %v2242_v29  ;;  %v1089_v19 = vmul.f32 %v1080_v24, %v2071_v58 }
 0x124   :  { %447 = vrot.lane.b32.xlu0 %v419_v21, %s1793_s19  ;;  %902 = vrot.lane.b32.xlu1 %v875_v63, %s1797_s11  ;;  %v1092_v63 = vmul.f32 %v1078_v43, %v2233_v22 }
 0x127   :  { %v2281_v49 = vpop.permute.xlu0 %663 }
 0x128   :  { %332 = vrot.lane.b32.xlu0 %v306_v4, %s1800_s20  ;;  %793 = vrot.lane.b32.xlu1 %v766_v9, %s1796_s28 }
 0x12c   :  { %336 = vrot.lane.b32.xlu0 %v308_v25, %s1800_s20  ;;  %326 = vrot.lane.b32.xlu1 %v303_v50, %s1800_s20 }
 0x12f   :  { %v2291_v7 = vpop.permute.xlu0 %552 }
 0x130   :  { %1009 = vrot.lane.b32.xlu0 %v983_v33, %s1798_s13  ;;  %320 = vrot.lane.b32.xlu1 %v2020_v32, %s1800_s20  ;;  %v874_v32 = vmul.f32 %v2166_v51, %v2233_v22  ;;  %v2287_v51 = vpop.permute.xlu1 %797 }
 0x134   :  { %1013 = vrot.lane.b32.xlu0 %v985_v37, %s1798_s13  ;;  %1120 = vrot.lane.b32.xlu1 %v1093_v41, %s1799_s16  ;;  %v654_v57 = vpop.permute.xlu1 %653 }
 0x137   :  { %v2305_v56 = vpop.permute.xlu0 %441 }
 0x138   :  { %900 = vrot.lane.b32.xlu0 %v874_v32, %s1797_s11  ;;  %1124 = vrot.lane.b32.xlu1 %v2259_v30, %s1799_s16  ;;  %v543_v44 = vpop.permute.xlu1 %542 }
 0x13c   :  { %904 = vrot.lane.b32.xlu0 %v876_v47, %s1797_s11  ;;  %1108 = vrot.lane.b32.xlu1 %v1087_v48, %s1799_s16  ;;  %v432_v3 = vpop.permute.xlu1 %431  ;;  %v1226_v48 = vld [vmem:[%s2620_s4] sm:$0xff] }
 0x13f   :  { %v2315_v18 = vpop.permute.xlu0 %330 }
 0x140   :  { %791 = vrot.lane.b32.xlu0 %v765_v5, %s1796_s28  ;;  %667 = vrot.lane.b32.xlu1 %v640_v6, %s1795_s25  ;;  %v1412_v5 = vld [vmem:[%s2622_s6 + $0x10] sm:$0xff]  ;;  %v1411_v6 = vld [vmem:[%s2622_s6 + $0x8] sm:$0xff] }
 0x144   :  { %795 = vrot.lane.b32.xlu0 %v767_v13, %s1796_s28  ;;  %671 = vrot.lane.b32.xlu1 %v642_v54, %s1795_s25 }
 0x148   :  { %324 = vrot.lane.b32.xlu0 %v302_v16, %s1800_s20  ;;  %556 = vrot.lane.b32.xlu1 %v529_v55, %s1794_s2  ;;  %v1413_v16 = vld [vmem:[%s2622_s6 + $0x18] sm:$0xff] }
 0x14c   :  { %328 = vrot.lane.b32.xlu0 %v304_v34, %s1800_s20  ;;  %560 = vrot.lane.b32.xlu1 %v531_v12, %s1794_s2 }
 0x150   :  { %1116 = vrot.lane.b32.xlu0 %v1091_v59, %s1799_s16  ;;  %445 = vrot.lane.b32.xlu1 %v418_v15, %s1793_s19 }
 0x152   :  { %v2324_v61 = vpop.permute.xlu0 %1001  ;;  %v2326_v60 = vpop.permute.xlu1 %997 }
 0x154   :  { %1110 = vrot.lane.b32.xlu0 %v1088_v20, %s1799_s16  ;;  %449 = vrot.lane.b32.xlu1 %v420_v62, %s1793_s19 }
 0x156   :  { %v2332_v21 = vpop.permute.xlu0 %892  ;;  %v2334_v26 = vpop.permute.xlu1 %888 }
 0x158   :  { %1118 = vrot.lane.b32.xlu0 %v1092_v63, %s1799_s16  ;;  %334 = vrot.lane.b32.xlu1 %v307_v1, %s1800_s20 }
 0x15a   :  { %v2348_v4 = vpop.permute.xlu0 %783  ;;  %v2350_v9 = vpop.permute.xlu1 %779 }
 0x15c   :  { %1122 = vrot.lane.b32.xlu0 %v1094_v11, %s1799_s16  ;;  %338 = vrot.lane.b32.xlu1 %v309_v14, %s1800_s20 }
 0x15e   :  { %v658_v45 = vpop.permute.xlu0 %657  ;;  %v656_v23 = vpop.permute.xlu1 %655 }
 0x15f   :  { %v2359_v25 = vsel %vm673_vm3, %v654_v57, %v656_v23  ;;  %v2362_v50 = vsel %vm673_vm3, %v656_v23, %v658_v45 }
 0x160   :  { %1114 = vrot.lane.b32.xlu0 %v2259_v30, %s1799_s16  ;;  %1112 = vrot.lane.b32.xlu1 %v1089_v19, %s1799_s16  ;;  %v1410_v30 = vld [vmem:[%s2622_s6] sm:$0xff] }
 0x162   :  { %v662_v33 = vpop.permute.xlu0 %661  ;;  %v660_v28 = vpop.permute.xlu1 %659 }
 0x163   :  { %v2373_v37 = vsel %vm673_vm3, %v658_v45, %v660_v28  ;;  %v2376_v41 = vsel %vm673_vm3, %v660_v28, %v662_v33 }
 0x164   :  { %1235 = vperm.xlu0 %1726, %v1227_v2   ;;  %1106 = vrot.lane.b32.xlu1 %v1086_v8, %s1799_s16 }
 0x166   :  { %v547_v32 = vpop.permute.xlu0 %546  ;;  %v545_v43 = vpop.permute.xlu1 %544 }
 0x167   :  { %v2383_v47 = vsel %vm562_vm2, %v543_v44, %v545_v43  ;;  %v2386_v17 = vsel %vm562_vm2, %v545_v43, %v547_v32 }
 0x168   :  { %1416 = vperm.xlu0 %1726, %v1410_v30   ;;  %1230 = vperm.xlu1 %1727, %v1226_v48  }
 0x16a   :  { %v551_v13 = vpop.permute.xlu0 %550  ;;  %v549_v54 = vpop.permute.xlu1 %548 }
 0x16b   :  { %v2398_v10 = vsel %vm562_vm2, %v547_v32, %v549_v54  ;;  %v2401_v57 = vsel %vm562_vm2, %v549_v54, %v551_v13 }
 0x16c   :  { %1426 = vperm.xlu0 %1726, %v1412_v5   ;;  %1421 = vperm.xlu1 %1727, %v1411_v6  }
 0x16e   :  { %v436_v55 = vpop.permute.xlu0 %435  ;;  %v434_v44 = vpop.permute.xlu1 %433 }
 0x16f   :  { %v2407_v34 = vsel %vm451_vm1, %v432_v3, %v434_v44  ;;  %v2410_v12 = vsel %vm451_vm1, %v434_v44, %v436_v55 }
 0x170   :  { %1431 = vperm.xlu1 %1727, %v1413_v16  }
 0x172   :  { %v440_v59 = vpop.permute.xlu0 %439  ;;  %v438_v15 = vpop.permute.xlu1 %437 }
 0x173   :  { %v2413_v20 = vsel %vm451_vm1, %v436_v55, %v438_v15  ;;  %v2416_v62 = vsel %vm451_vm1, %v438_v15, %v440_v59 }
 0x176   :  { %v1008_v63 = vpop.permute.xlu0 %1007  ;;  %v2418_v1 = vpop.permute.xlu1 %322 }
 0x177   :  { %2630 = vst [vmem:[#allocation10_spill] sm:$0xff] %v2418_v1 }
 0x17a   :  { %v899_v40 = vpop.permute.xlu0 %898  ;;  %v1000_v24 = vpop.permute.xlu1 %999 }
 0x17b   :  { %v1018_v15 = vsel %vm402_vm6, %v1000_v24, %v2324_v61  ;;  %v1017_v0 = vsel %vm402_vm6, %v2326_v60, %v1000_v24 }
 0x17e   :  { %v790_v11 = vpop.permute.xlu0 %789  ;;  %v1004_v3 = vpop.permute.xlu1 %1003 }
 0x182   :  { %v2420_v14 = vpop.permute.xlu0 %665  ;;  %v891_v19 = vpop.permute.xlu1 %890 }
 0x186   :  { %v2422_v45 = vpop.permute.xlu0 %669  ;;  %v895_v23 = vpop.permute.xlu1 %894 }
 0x18a   :  { %v2424_v2 = vpop.permute.xlu0 %554  ;;  %v782_v33 = vpop.permute.xlu1 %781 }
 0x18e   :  { %v2426_v28 = vpop.permute.xlu0 %558  ;;  %v2428_v8 = vpop.permute.xlu1 %785 }
 0x192   :  { %v2430_v30 = vpop.permute.xlu0 %443  ;;  %v1012_v32 = vpop.permute.xlu1 %1011 }
 0x196   :  { %v2432_v43 = vpop.permute.xlu0 %447  ;;  %v903_v48 = vpop.permute.xlu1 %902 }
 0x19a   :  { %v2434_v5 = vpop.permute.xlu0 %332  ;;  %v794_v6 = vpop.permute.xlu1 %793 }
 0x19e   :  { %v2436_v13 = vpop.permute.xlu0 %336  ;;  %v2438_v54 = vpop.permute.xlu1 %326 }
 0x19f   :  { %2631 = vst [vmem:[#allocation11_spill] sm:$0xff] %v2436_v13  ;;  %2632 = vst [vmem:[#allocation12_spill] sm:$0xff] %v2438_v54 }
 0x1a2   :  { %v1010_v16 = vpop.permute.xlu0 %1009  ;;  %v2440_v55 = vpop.permute.xlu1 %320 }
 0x1a3   :  { %v1021_v44 = vsel %vm402_vm6, %v1008_v63, %v1010_v16  ;;  %v1022_v59 = vsel %vm402_vm6, %v1010_v16, %v1012_v32  ;;  %v1020_v16 = vsel %vm402_vm6, %v1004_v3, %v2240_v27  ;;  %v908_v27 = vsel %vm513_vm5, %v2334_v26, %v891_v19 }
 0x1a4   :  { %1244 = vmatprep.subr.mxu0 %v1022_v59 }
 0x1a5   :  { %1245 = vmatpush1.msra.mxu0 %v1021_v44  ;;  %v1019_v44 = vsel %vm402_vm6, %v2324_v61, %v1004_v3 }
 0x1a6   :  { %v1014_v1 = vpop.permute.xlu0 %1013  ;;  %1246 = vmatprep.subr.mxu0 %v1018_v15  ;;  %v2448_v13 = vpop.permute.xlu1 %1120 }
 0x1a7   :  { %v1023_v54 = vsel %vm402_vm6, %v1012_v32, %v1014_v1  ;;  %1247 = vmatpush1.msra.mxu0 %v1017_v0  ;;  %v1024_v63 = vsel %vm402_vm6, %v1014_v1, %v2261_v42  ;;  %v909_v42 = vsel %vm513_vm5, %v891_v19, %v2332_v21  ;;  %v911_v32 = vsel %vm513_vm5, %v895_v23, %v2253_v36 }
 0x1a8   :  { %1321 = vmatprep.subr.mxu1 %v1024_v63  ;;  %v799_v63 = vsel %vm624_vm4, %v2350_v9, %v782_v33  ;;  %v801_v9 = vsel %vm624_vm4, %v2348_v4, %v2428_v8 }
 0x1a9   :  { %1322 = vmatpush1.msra.mxu1 %v1023_v54  ;;  %v910_v54 = vsel %vm513_vm5, %v2332_v21, %v895_v23  ;;  %v802_v23 = vsel %vm624_vm4, %v2428_v8, %v2269_v31 }
 0x1aa   :  { %v901_v59 = vpop.permute.xlu0 %900  ;;  %1323 = vmatprep.subr.mxu1 %v1020_v16  ;;  %v2457_v60 = vpop.permute.xlu1 %1124 }
 0x1ab   :  { %v912_v24 = vsel %vm513_vm5, %v899_v40, %v901_v59  ;;  %1324 = vmatpush1.msra.mxu1 %v1019_v44  ;;  %v913_v0 = vsel %vm513_vm5, %v901_v59, %v903_v48 }
 0x1ac   :  { %1248 = vmatprep.subr.mxu0 %v913_v0 }
 0x1ad   :  { %1249 = vmatpush1.msra.mxu0 %v912_v24 }
 0x1ae   :  { %v905_v1 = vpop.permute.xlu0 %904  ;;  %1250 = vmatprep.subr.mxu0 %v909_v42  ;;  %v2465_v61 = vpop.permute.xlu1 %1108 }
 0x1af   :  { %v914_v3 = vsel %vm513_vm5, %v903_v48, %v905_v1  ;;  %1251 = vmatpush1.msra.mxu0 %v908_v27  ;;  %v915_v40 = vsel %vm513_vm5, %v905_v1, %v2274_v46  ;;  %v800_v46 = vsel %vm624_vm4, %v782_v33, %v2348_v4  ;;  %v1150_v27 = vld [vmem:[%s2619_s3] sm:$0xff] }
 0x1b0   :  { %1325 = vmatprep.subr.mxu1 %v915_v40  ;;  %v1153_v40 = vld [vmem:[%s2619_s3 + $0x18] sm:$0xff] }
 0x1b1   :  { %1326 = vmatpush1.msra.mxu1 %v914_v3 }
 0x1b2   :  { %v792_v15 = vpop.permute.xlu0 %791  ;;  %1327 = vmatprep.subr.mxu1 %v911_v32  ;;  %v668_v26 = vpop.permute.xlu1 %667  ;;  %v2636_v32 = vmov 0.0  }
 0x1b3   :  { %v803_v19 = vsel %vm624_vm4, %v790_v11, %v792_v15  ;;  %1328 = vmatpush1.msra.mxu1 %v910_v54  ;;  %v804_v48 = vsel %vm624_vm4, %v792_v15, %v794_v6 }
 0x1b4   :  { %1252 = vmatprep.subr.mxu0 %v804_v48 }
 0x1b5   :  { %1253 = vmatpush1.msra.mxu0 %v803_v19 }
 0x1b6   :  { %v796_v36 = vpop.permute.xlu0 %795  ;;  %1254 = vmatprep.subr.mxu0 %v800_v46  ;;  %v672_v16 = vpop.permute.xlu1 %671 }
 0x1b7   :  { %v805_v21 = vsel %vm624_vm4, %v794_v6, %v796_v36  ;;  %1255 = vmatpush1.msra.mxu0 %v799_v63  ;;  %v806_v11 = vsel %vm624_vm4, %v796_v36, %v2287_v51 }
 0x1b8   :  { %1256 = vmatprep.subr.mxu0 %v2233_v22  ;;  %1329 = vmatprep.subr.mxu1 %v806_v11  ;;  %v678_v22 = vsel %vm673_vm3, %v2281_v49, %v2420_v14  ;;  %v681_v49 = vsel %vm673_vm3, %v2422_v45, %v672_v16 }
 0x1b9   :  { %1257 = vmatpush1.msra.mxu0 %v2125_v35  ;;  %1330 = vmatpush1.msra.mxu1 %v805_v21  ;;  %v679_v35 = vsel %vm673_vm3, %v2420_v14, %v668_v26 }
 0x1ba   :  { %v2491_v33 = vpop.permute.xlu0 %324  ;;  %1258 = vmatprep.subr.mxu0 %v2057_v52  ;;  %1331 = vmatprep.subr.mxu1 %v802_v23  ;;  %v557_v51 = vpop.permute.xlu1 %556 }
 0x1bb   :  { %1259 = vmatpush1.msra.mxu0 %v2024_v38  ;;  %1332 = vmatpush1.msra.mxu1 %v801_v9  ;;  %v568_v52 = vsel %vm562_vm2, %v2424_v2, %v557_v51 }
 0x1bc   :  { %1260 = vmatprep.subr.mxu0 %v679_v35  ;;  %1333 = vmatprep.subr.mxu1 %v2242_v29  ;;  %v680_v29 = vsel %vm673_vm3, %v668_v26, %v2422_v45 }
 0x1bd   :  { %1261 = vmatpush1.msra.mxu0 %v678_v22  ;;  %1334 = vmatpush1.msra.mxu1 %v2168_v53  ;;  %v567_v53 = vsel %vm562_vm2, %v2291_v7, %v2424_v2 }
 0x1be   :  { %v329_v31 = vpop.permute.xlu0 %328  ;;  %1262 = vmatprep.subr.mxu0 %v2362_v50  ;;  %1335 = vmatprep.subr.mxu1 %v2071_v58  ;;  %v561_v38 = vpop.permute.xlu1 %560  ;;  %v569_v50 = vsel %vm562_vm2, %v557_v51, %v2426_v28 }
 0x1bf   :  { %1263 = vmatpush1.msra.mxu0 %v2359_v25  ;;  %1336 = vmatpush1.msra.mxu1 %v2026_v39  ;;  %v570_v4 = vsel %vm562_vm2, %v2426_v28, %v561_v38  ;;  %v456_v25 = vsel %vm451_vm1, %v2305_v56, %v2430_v30  ;;  %v2634_v28 = vld [vmem:[#allocation11_spill] sm:$0xff] }
 0x1c0   :  { %1264 = vmatprep.subr.mxu0 %v568_v52  ;;  %1337 = vmatprep.subr.mxu1 %v681_v49 }
 0x1c1   :  { %1265 = vmatpush1.msra.mxu0 %v567_v53  ;;  %1338 = vmatpush1.msra.mxu1 %v680_v29 }
 0x1c2   :  { %v1117_v58 = vpop.permute.xlu0 %1116  ;;  %1266 = vmatprep.subr.mxu0 %v2386_v17  ;;  %1339 = vmatprep.subr.mxu1 %v2376_v41  ;;  %v446_v39 = vpop.permute.xlu1 %445 }
 0x1c3   :  { %1267 = vmatpush1.msra.mxu0 %v2383_v47  ;;  %1340 = vmatpush1.msra.mxu1 %v2373_v37  ;;  %v457_v7 = vsel %vm451_vm1, %v2430_v30, %v446_v39  ;;  %v458_v47 = vsel %vm451_vm1, %v446_v39, %v2432_v43  ;;  %v1406_v39 = vld [vmem:[%s2621_s5] sm:$0xff] }
 0x1c4   :  { %1268 = vmatprep.subr.mxu0 %v457_v7  ;;  %1341 = vmatprep.subr.mxu1 %v570_v4  ;;  %v1407_v4 = vld [vmem:[%s2621_s5 + $0x8] sm:$0xff] }
 0x1c5   :  { %1269 = vmatpush1.msra.mxu0 %v456_v25  ;;  %1342 = vmatpush1.msra.mxu1 %v569_v50  ;;  %v1408_v25 = vld [vmem:[%s2621_s5 + $0x10] sm:$0xff]  ;;  %v1409_v50 = vld [vmem:[%s2621_s5 + $0x18] sm:$0xff]  ;;  %s1801_s5 = smov [#allocation7]  }
 0x1c6   :  { %v1111_v41 = vpop.permute.xlu0 %1110  ;;  %1270 = vmatprep.subr.mxu0 %v2410_v12  ;;  %1343 = vmatprep.subr.mxu1 %v2401_v57  ;;  %v450_v37 = vpop.permute.xlu1 %449  ;;  %s1677_s21 = sshll.u32 %s1801_s5, 4  ;;  %s1678_s21 = int_to_ptr.vmem [resolvable:$true] %s1677_s21 }
 0x1c7   :  { %1271 = vmatpush1.msra.mxu0 %v2407_v34  ;;  %1344 = vmatpush1.msra.mxu1 %v2398_v10  ;;  %v459_v56 = vsel %vm451_vm1, %v2432_v43, %v450_v37  ;;  %v345_v10 = vsel %vm340_vm8, %v2315_v18, %v2434_v5  ;;  %v2633_v34 = vld [vmem:[#allocation10_spill] sm:$0xff]  ;;  %v1127_v43 = vsel %vm291_vm7, %v2465_v61, %v1111_v41  ;;  %s1764_s19 = scalar_lea.vmem %s1678_s21, 2048  ;;  %p1769_p6 = scmp.lt.s32.totalorder %s1678_s21, %s1678_s21 }
 0x1c8   :  { %1345 = vmatprep.subr.mxu1 %v459_v56  ;;  %v342_v12 = vsel %vm340_vm8, %v2633_v34, %v2491_v33  ;;  %p1765_p5 = scmp.ne.s32.totalorder %s1678_s21, %s1764_s19  ;;  %p1770_p7 = scmp.lt.s32.totalorder %s1764_s19, %s1764_s19 }
 0x1c9   :  { %1346 = vmatpush1.msra.mxu1 %v458_v47 }
 0x1ca   :  { %v1119_v17 = vpop.permute.xlu0 %1118  ;;  %1347 = vmatprep.subr.mxu1 %v2416_v62  ;;  %v335_v14 = vpop.permute.xlu1 %334  ;;  %v341_v62 = vsel %vm340_vm8, %v2440_v55, %v2633_v34  ;;  %p1771_p8 = por %p1770_p7, %p1769_p6 }
 0x1cb   :  { %1348 = vmatpush1.msra.mxu1 %v2413_v20  ;;  %v346_v57 = vsel %vm340_vm8, %v2434_v5, %v335_v14  ;;  %v1131_v2 = vsel %vm291_vm7, %v1119_v17, %v2448_v13  ;;  %v1130_v8 = vsel %vm291_vm7, %v1117_v58, %v1119_v17  ;;  %v347_v30 = vsel %vm340_vm8, %v335_v14, %v2634_v28  ;;  %v2635_v5 = vld [vmem:[#allocation12_spill] sm:$0xff] }
 0x1cc   :  { %1272 = vmatprep.subr.mxu0 %v346_v57  ;;  %v344_v6 = vsel %vm340_vm8, %v2635_v5, %v329_v31  ;;  %v343_v55 = vsel %vm340_vm8, %v2491_v33, %v2635_v5  ;;  %v1728_v57 = vld [vmem:[#allocation4 + $0x10] sm:$0xff]  ;;  %p1772_p9 = pnand %p1771_p8, %p1765_p5 }
 0x1cd   :  { %1273 = vmatpush1.msra.mxu0 %v345_v10 }
 0x1ce   :  { %v1123_v45 = vpop.permute.xlu0 %1122  ;;  %1274 = vmatprep.subr.mxu0 %v342_v12  ;;  %v339_v20 = vpop.permute.xlu1 %338 }
 0x1cf   :  { %1275 = vmatpush1.msra.mxu0 %v341_v62  ;;  %v348_v18 = vsel %vm340_vm8, %v2634_v28, %v339_v20  ;;  %v1133_v24 = vsel %vm291_vm7, %v1123_v45, %v2457_v60  ;;  %v1132_v0 = vsel %vm291_vm7, %v2448_v13, %v1123_v45  ;;  %v1152_v13 = vld [vmem:[%s2619_s3 + $0x10] sm:$0xff]  ;;  %v1729_v45 = vld [vmem:[#allocation4] sm:$0xff] }
 0x1d0   :  { %1304 = vmatprep.subr.mxu0 %v1131_v2  ;;  %1349 = vmatprep.subr.mxu1 %v348_v18 }
 0x1d1   :  { %1305 = vmatpush2.msra.mxu0 %v1130_v8  ;;  %1350 = vmatpush1.msra.mxu1 %v347_v30  ;;  %v1730_v8 = vld [vmem:[#allocation4 + $0x18] sm:$0xff] }
 0x1d2   :  { %v1115_v44 = vpop.permute.xlu0 %1114  ;;  %1306 = vmatprep.subr.mxu0 %v1127_v43  ;;  %1351 = vmatprep.subr.mxu1 %v344_v6  ;;  %v1113_v59 = vpop.permute.xlu1 %1112 }
 0x1d3   :  { %1352 = vmatpush1.msra.mxu1 %v343_v55  ;;  %v1129_v42 = vsel %vm291_vm7, %v1113_v59, %v1115_v44  ;;  %v1128_v1 = vsel %vm291_vm7, %v1111_v41, %v1113_v59  ;;  %v1731_v55 = vld [vmem:[#allocation4 + $0x8] sm:$0xff] }
 0x1d4   :  { %1381 = vmatprep.subr.mxu1 %v1133_v24 }
 0x1d5   :  { %1382 = vmatpush2.msra.mxu1 %v1132_v0 }
 0x1d6   :  { %1383 = vmatprep.subr.mxu1 %v1129_v42  ;;  %v1107_v3 = vpop.permute.xlu1 %1106  ;;  %v1732_v42 = vld [vmem:[#allocation4 + $0x30] sm:$0xff] }
 0x1d7   :  { %v1126_v60 = vsel %vm291_vm7, %v1107_v3, %v2465_v61  ;;  %1384 = vmatpush2.msra.mxu1 %v1128_v1 }
 0x1d8   :  { %1307 = vmatpush2.msra.mxu0 %v1126_v60  ;;  %1386 = vmatmul.mubr.f32.vlgmr.msra.gmra.mxu1 %v1150_v27 }
 0x1d9   :  { %1309 = vmatmul.mubr.f32.vlgmr.msra.gmra.mxu0 %v1150_v27  ;;  %1703 = vmatprep.mubr.msk.f32.mxu1 %vm451_vm1, %v1153_v40 }
 0x1da   :  { %1701 = vmatprep.mubr.msk.f32.mxu0 %vm451_vm1, %v1153_v40 }
 0x1dc   :  { %1392 = vmatmul.mubr.f32.gmra.mxu1 %v1152_v13 }
 0x1dd   :  { %1315 = vmatmul.mubr.f32.gmra.mxu0 %v1152_v13  ;;  %1599 = vmatprep.mubr.f32.mxu1 %v2636_v32  ;;  %v1733_v13 = vld [vmem:[#allocation4 + $0x20] sm:$0xff] }
 0x1de   :  { %1510 = vmatprep.mubr.f32.mxu0 %v2636_v32 }
 0x1df   :  { %v1236_v46 = vpop.permute.xlu0 %1235 }
 0x1e3   :  { %v1231_v19 = vpop.permute.xlu1 %1230  ;;  %v1417_v41 = vpop.permute.xlu0 %1416 }
 0x1e7   :  { %v1422_v62 = vpop.permute.xlu1 %1421  ;;  %v1427_v40 = vpop.permute.xlu0 %1426 }
 0x298   :  { %v1387_v54 = vpop.f32.mrf.mxu1 }
 0x299   :  { %v1310_v61 = vpop.f32.mrf.mxu0  ;;  %v1388_v33 = vadd.f32 %v1387_v54, %v1231_v19 }
 0x29a   :  { %v1389_v15 = vpop.f32.mrf.mxu1  ;;  %v1311_v22 = vadd.f32 %v1310_v61, %v1231_v19 }
 0x29b   :  { %v1312_v26 = vpop.f32.mrf.mxu0  ;;  %v1390_v21 = vadd.f32 %v1389_v15, %v1231_v19  ;;  %v1400_v29 = vmax.f32 %v1388_v33, 0.0 }
 0x29c   :  { %v1393_v48 = vpop.f32.mrf.mxu1  ;;  %v1313_v51 = vadd.f32 %v1312_v26, %v1231_v19  ;;  %v1398_v7 = vmax.f32 %v1311_v22, 0.0  ;;  %v1734_v26 = vld [vmem:[#allocation4 + $0x38] sm:$0xff]  ;;  %v1432_v22 = vpop.permute.xlu1 %1431 }
 0x29d   :  { %v1316_v63 = vpop.f32.mrf.mxu0  ;;  %v1394_v36 = vadd.f32 %v1393_v48, %v1236_v46  ;;  %v1401_v49 = vmax.f32 %v1390_v21, 0.0 }
 0x29e   :  { %v1395_v16 = vpop.f32.mrf.mxu1  ;;  %v1317_v11 = vadd.f32 %v1316_v63, %v1236_v46  ;;  %v1399_v58 = vmax.f32 %v1313_v51, 0.0 }
 0x29f   :  { %v1396_v23 = vadd.f32 %v1395_v16, %v1236_v46  ;;  %v1318_v9 = vpop.f32.mrf.mxu0  ;;  %v1404_v38 = vmax.f32 %v1394_v36, 0.0  ;;  %v1735_v36 = vld [vmem:[#allocation4 + $0x28] sm:$0xff] }
 0x2a0   :  { %v1319_v35 = vadd.f32 %v1318_v9, %v1236_v46  ;;  %v1402_v53 = vmax.f32 %v1317_v11, 0.0  ;;  %v1736_v9 = vld [vmem:[#allocation4 + $0x50] sm:$0xff] }
 0x2a1   :  { %v1405_v31 = vmax.f32 %v1396_v23, 0.0 }
 0x2a2   :  { %v1403_v52 = vmax.f32 %v1319_v35, 0.0 }
 0x2a3   :  { %1563 = vmatprep.subr.mxu1 %v1405_v31 }
 0x2a4   :  { %1474 = vmatprep.subr.mxu0 %v1403_v52  ;;  %1564 = vmatpush1.msra.mxu1 %v1404_v38  ;;  %v1737_v38 = vld [vmem:[#allocation4 + $0x40] sm:$0xff] }
 0x2a5   :  { %1475 = vmatpush1.msra.mxu0 %v1402_v53  ;;  %1565 = vmatprep.subr.mxu1 %v1401_v49 }
 0x2a6   :  { %1476 = vmatprep.subr.mxu0 %v1399_v58  ;;  %1566 = vmatpush1.msra.mxu1 %v1400_v29  ;;  %v1738_v58 = vld [vmem:[#allocation4 + $0x58] sm:$0xff] }
 0x2a7   :  { %1477 = vmatpush1.msra.mxu0 %v1398_v7  ;;  %1708 = vmatmul.mubr.msk.f32.vlgmr.msra.gmra.mxu1 %vm451_vm1, %v1406_v39 }
 0x2a8   :  { %1704 = vmatmul.mubr.msk.f32.vlgmr.msra.gmra.mxu0 %vm451_vm1, %v1406_v39  ;;  %1605 = vmatprep.mubr.f32.mxu1 %v2636_v32 }
 0x2a9   :  { %1516 = vmatprep.mubr.f32.mxu0 %v2636_v32 }
 0x2ab   :  { %1709 = vmatmul.mubr.msk.f32.gmra.mxu1 %vm451_vm1, %v1407_v4 }
 0x2ac   :  { %1705 = vmatmul.mubr.msk.f32.gmra.mxu0 %vm451_vm1, %v1407_v4  ;;  %1611 = vmatprep.mubr.f32.mxu1 %v2636_v32 }
 0x2ad   :  { %1522 = vmatprep.mubr.f32.mxu0 %v2636_v32 }
 0x2af   :  { %1710 = vmatmul.mubr.msk.f32.gmra.mxu1 %vm451_vm1, %v1408_v25 }
 0x2b0   :  { %1706 = vmatmul.mubr.msk.f32.gmra.mxu0 %vm451_vm1, %v1408_v25  ;;  %1617 = vmatprep.mubr.f32.mxu1 %v2636_v32 }
 0x2b1   :  { %1528 = vmatprep.mubr.f32.mxu0 %v2636_v32 }
 0x2b3   :  { %1711 = vmatmul.mubr.msk.f32.gmra.mxu1 %vm451_vm1, %v1409_v50 }
 0x2b4   :  { %1707 = vmatmul.mubr.msk.f32.gmra.mxu0 %vm451_vm1, %v1409_v50  ;;  %v1739_v50 = vld [vmem:[#allocation4 + $0x48] sm:$0xff] }
 0x367   :  { %v1601_v37 = vpop.f32.mrf.mxu1 }
 0x368   :  { %v1602_v56 = vadd.f32 %v1601_v37, %v1417_v41  ;;  %v1512_v47 = vpop.f32.mrf.mxu0 }
 0x369   :  { %v1513_v17 = vadd.f32 %v1512_v47, %v1417_v41  ;;  %v1603_v14 = vpop.f32.mrf.mxu1 }
 0x36a   :  { %v1626_v10 = vadd.f32 %v1728_v57, %v1602_v56  ;;  %v1604_v34 = vadd.f32 %v1603_v14, %v1417_v41  ;;  %v1514_v12 = vpop.f32.mrf.mxu0 }
 0x36b   :  { %v1624_v20 = vadd.f32 %v1729_v45, %v1513_v17  ;;  %v1515_v2 = vadd.f32 %v1514_v12, %v1417_v41  ;;  %v1607_v28 = vpop.f32.mrf.mxu1  ;;  %v1740_v17 = vld [vmem:[#allocation4 + $0x70] sm:$0xff]  ;;  %v1741_v12 = vld [vmem:[#allocation4 + $0x60] sm:$0xff] }
 0x36c   :  { %v1642_v18 = vmax.f32 %v1626_v10, 0.0  ;;  %v1627_v30 = vadd.f32 %v1730_v8, %v1604_v34  ;;  %v1608_v43 = vadd.f32 %v1607_v28, %v1422_v62  ;;  %v1518_v5 = vpop.f32.mrf.mxu0  ;;  %v1743_v8 = vld [vmem:[#allocation4 + $0x68] sm:$0xff] }
 0x36d   :  { %v1640_v6 = vmax.f32 %v1624_v20, 0.0  ;;  %v1625_v44 = vadd.f32 %v1731_v55, %v1515_v2  ;;  %v1519_v59 = vadd.f32 %v1518_v5, %v1422_v62  ;;  %v1609_v24 = vpop.f32.mrf.mxu1  ;;  %v1742_v2 = vld [vmem:[#allocation4 + $0x78] sm:$0xff] }
 0x36e   :  { %1658 = vst [vmem:[#allocation7 + $0x10] sm:$0xff] %v1642_v18  ;;  %v1643_v0 = vmax.f32 %v1627_v30, 0.0  ;;  %v1630_v27 = vadd.f32 %v1732_v42, %v1608_v43  ;;  %v1610_v1 = vadd.f32 %v1609_v24, %v1422_v62  ;;  %v1520_v3 = vpop.f32.mrf.mxu0 }
 0x36f   :  { %1656 = vst [vmem:[#allocation7] sm:$0xff] %v1640_v6  ;;  %v1641_v60 = vmax.f32 %v1625_v44, 0.0  ;;  %v1628_v32 = vadd.f32 %v1733_v13, %v1519_v59  ;;  %v1521_v54 = vadd.f32 %v1520_v3, %v1422_v62  ;;  %v1613_v61 = vpop.f32.mrf.mxu1 }
 0x370   :  { %1659 = vst [vmem:[#allocation7 + $0x18] sm:$0xff] %v1643_v0  ;;  %v1646_v15 = vmax.f32 %v1630_v27, 0.0  ;;  %v1631_v19 = vadd.f32 %v1734_v26, %v1610_v1  ;;  %v1614_v48 = vadd.f32 %v1613_v61, %v1427_v40  ;;  %v1524_v46 = vpop.f32.mrf.mxu0 }
 0x371   :  { %1657 = vst [vmem:[#allocation7 + $0x8] sm:$0xff] %v1641_v60  ;;  %v1644_v63 = vmax.f32 %v1628_v32, 0.0  ;;  %v1629_v16 = vadd.f32 %v1735_v36, %v1521_v54  ;;  %v1525_v21 = vadd.f32 %v1524_v46, %v1427_v40  ;;  %v1615_v11 = vpop.f32.mrf.mxu1 }
 0x372   :  { %1662 = vst [vmem:[#allocation7 + $0x30] sm:$0xff] %v1646_v15  ;;  %v1647_v23 = vmax.f32 %v1631_v19, 0.0  ;;  %v1634_v33 = vadd.f32 %v1736_v9, %v1614_v48  ;;  %v1616_v51 = vadd.f32 %v1615_v11, %v1427_v40  ;;  %v1526_v35 = vpop.f32.mrf.mxu0 }
 0x373   :  { %1660 = vst [vmem:[#allocation7 + $0x20] sm:$0xff] %v1644_v63  ;;  %v1645_v31 = vmax.f32 %v1629_v16, 0.0  ;;  %v1632_v52 = vadd.f32 %v1737_v38, %v1525_v21  ;;  %v1527_v49 = vadd.f32 %v1526_v35, %v1427_v40  ;;  %v1619_v53 = vpop.f32.mrf.mxu1 }
 0x374   :  { %1663 = vst [vmem:[#allocation7 + $0x38] sm:$0xff] %v1647_v23  ;;  %v1650_v29 = vmax.f32 %v1634_v33, 0.0  ;;  %v1635_v39 = vadd.f32 %v1738_v58, %v1616_v51  ;;  %v1620_v7 = vadd.f32 %v1619_v53, %v1432_v22  ;;  %v1530_v4 = vpop.f32.mrf.mxu0 }
 0x375   :  { %1661 = vst [vmem:[#allocation7 + $0x28] sm:$0xff] %v1645_v31  ;;  %v1648_v25 = vmax.f32 %v1632_v52, 0.0  ;;  %v1633_v41 = vadd.f32 %v1739_v50, %v1527_v49  ;;  %v1531_v37 = vadd.f32 %v1530_v4, %v1432_v22  ;;  %v1621_v56 = vpop.f32.mrf.mxu1 }
 0x376   :  { %1666 = vst [vmem:[#allocation7 + $0x50] sm:$0xff] %v1650_v29  ;;  %v1651_v47 = vmax.f32 %v1635_v39, 0.0  ;;  %v1638_v14 = vadd.f32 %v1740_v17, %v1620_v7  ;;  %v1622_v57 = vadd.f32 %v1621_v56, %v1432_v22  ;;  %v1532_v10 = vpop.f32.mrf.mxu0 }
 0x377   :  { %1664 = vst [vmem:[#allocation7 + $0x40] sm:$0xff] %v1648_v25  ;;  %v1649_v34 = vmax.f32 %v1633_v41, 0.0  ;;  %v1636_v62 = vadd.f32 %v1741_v12, %v1531_v37  ;;  %v1533_v45 = vadd.f32 %v1532_v10, %v1432_v22 }
 0x378   :  { %1667 = vst [vmem:[#allocation7 + $0x58] sm:$0xff] %v1651_v47  ;;  %v1654_v20 = vmax.f32 %v1638_v14, 0.0  ;;  %v1639_v28 = vadd.f32 %v1742_v2, %v1622_v57 }
 0x379   :  { %1665 = vst [vmem:[#allocation7 + $0x48] sm:$0xff] %v1649_v34  ;;  %v1652_v18 = vmax.f32 %v1636_v62, 0.0  ;;  %v1637_v30 = vadd.f32 %v1743_v8, %v1533_v45 }
 0x37a   :  { %1670 = vst [vmem:[#allocation7 + $0x70] sm:$0xff] %v1654_v20  ;;  %v1655_v43 = vmax.f32 %v1639_v28, 0.0 }
 0x37b   :  { %1668 = vst [vmem:[#allocation7 + $0x60] sm:$0xff] %v1652_v18  ;;  %v1653_v5 = vmax.f32 %v1637_v30, 0.0 }
 0x37c   :  { %1671 = vst [vmem:[#allocation7 + $0x78] sm:$0xff] %v1655_v43 }
 0x37d   :  { %1669 = vst [vmem:[#allocation7 + $0x68] sm:$0xff] %v1653_v5 }
 0x37e   :  { %1775 = shalt.err (!%p1772_p9)
}
 0x37f   :  { %1683 = dma.vmem_to_hbm [thread:$0]  %s1678_s21, 2048, %s2624_s8, [#allocation6], %s1789_s30, %s1789_s30, %s1790_s9  }
 0x380   :  { %1786 = dma.done.wait [#allocation6], 2048  }
 0x381   :  { %1787 = vsyncadd [#allocation6], 4294965248 }
 0x382   :  { %1687 = vsyncpa [#allocation5], 1 }
 0x383   :  { %1688 = vsyncpa [#allocation6], 1 }

</bundles_post_ra>
